<compile_context>
chip_gen: v7x
topology: tpu7x:2x2x1
jax: 0.10.0
libtpu: 0.0.40
codegen_flags: <defaults>
</compile_context>

<pallas_src>
import jax
import jax.numpy as jnp
from jax.experimental import pallas as pl
from jax.experimental.pallas import tpu as pltpu

BN_EPS = 1e-5


def _round_up(x, m):
    return (x + m - 1) // m * m


def _cdiv(a, b):
    return (a + b - 1) // b


# ---------------------------------------------------------------------------
# Kernel: fused (BN-folded) Linear(F,1024)+ReLU -> Linear(1024,512)+ReLU
#         -> Linear(512,1) -> Sigmoid.
# Grid = (batch tiles ["parallel"], K tiles ["arbitrary"]).  In the default
# resident-w1 configuration the K axis has a single step.
# ---------------------------------------------------------------------------
def _mlp_kernel(x_ref, w1_ref, b1_ref, w2_ref, b2_ref, w3_ref, b3_ref,
                o_ref, acc_ref):
    k = pl.program_id(1)

    # Layer 1: bf16 x bf16 MXU matmul with f32 accumulation across K tiles.
    prod = jnp.dot(x_ref[...], w1_ref[...], preferred_element_type=jnp.float32)

    @pl.when(k == 0)
    def _():
        acc_ref[...] = prod            # init with first partial (no zero pass)

    @pl.when(k > 0)
    def _():
        acc_ref[...] += prod

    @pl.when(k == pl.num_programs(1) - 1)
    def _():
        h1 = jnp.maximum(acc_ref[...] + b1_ref[...], 0.0)            # ReLU, f32
        # (Dropout = identity in eval.)  Linear(1024,512) + ReLU.
        h2 = jnp.dot(h1.astype(jnp.bfloat16), w2_ref[...],
                     preferred_element_type=jnp.float32)
        h2 = jnp.maximum(h2 + b2_ref[...], 0.0)
        # Linear(512,1): VPU multiply + lane reduction (skip an N=1 MXU pass).
        logits = jnp.sum(h2 * w3_ref[...], axis=-1, keepdims=True) + b3_ref[...]
        o_ref[...] = jax.nn.sigmoid(logits).astype(o_ref.dtype)


# ---------------------------------------------------------------------------
# One-time parameter preparation (hoisted out of the per-call forward).
# ---------------------------------------------------------------------------
def prepare_params(params, *, tk=None, resident_budget_bytes=24 << 20):
    """Fold eval-mode BN into Linear1, cast weights to bf16, pad K. Run once."""
    F = params["w1"].shape[0]
    hi = jax.lax.Precision.HIGHEST

    scale = params["bn_gamma"] * jax.lax.rsqrt(params["bn_var"] + BN_EPS)  # (1,F)
    shift = params["bn_beta"] - params["bn_mean"] * scale                  # (1,F)
    w1f = params["w1"] * scale.reshape(-1, 1)                              # (F,1024)
    b1f = params["b1"] + jnp.dot(shift, params["w1"], precision=hi)        # (1,1024)

    if tk is None:
        kp128 = _round_up(F, 128)
        # Keep w1 fully resident when its (double-buffered) bf16 footprint is
        # modest; otherwise stream it along K (safe for v7x's 64 MiB VMEM).
        if 2 * kp128 * 1024 * 2 <= resident_budget_bytes:
            tk = kp128                     # single K step, w1 resident
        else:
            tk = 2048                      # K-streamed fallback for huge F
    Kp = _round_up(F, tk)

    w1p = jnp.zeros((Kp, 1024), jnp.bfloat16).at[:F].set(w1f.astype(jnp.bfloat16))
    prep = {
        "F": F, "Kp": Kp, "tk": tk,
        "w1": w1p,                                           # (Kp,1024) bf16
        "b1": b1f.astype(jnp.float32),                       # (1,1024)  f32
        "w2": params["w2"].astype(jnp.bfloat16),              # (1024,512) bf16
        "b2": params["b2"].astype(jnp.float32),               # (1,512)   f32
        "w3": params["w3"].reshape(1, -1).astype(jnp.float32),  # (1,512)  f32
        "b3": params["b3"].reshape(1, 1).astype(jnp.float32),   # (1,1)    f32
    }
    return jax.tree_util.tree_map(
        lambda v: jax.block_until_ready(v) if isinstance(v, jax.Array) else v, prep)


# ---------------------------------------------------------------------------
# Forward (per call: only pad+cast x, then the fused Pallas kernel).
# ---------------------------------------------------------------------------
def network_forward(x, prep, *, tm=None):
    """x: (B, F) float32.  prep: dict from prepare_params()."""
    B, F = x.shape
    assert F == prep["F"], "input feature size does not match prepared params"
    Kp, tk = prep["Kp"], prep["tk"]

    if tm is None:
        if B <= 128:
            tm = _round_up(B, 8)                    # single tile, minimal M pad
        else:
            n_tiles = max(2, _cdiv(B, 256))         # >=2 tiles for v7x megacore
            tm = _round_up(_cdiv(B, n_tiles), 8)
    Mp = _round_up(B, tm)

    # x: pad + cast to bf16 once in the wrapper (half the DMA bytes of f32).
    xp = jnp.zeros((Mp, Kp), jnp.bfloat16).at[:B, :F].set(x.astype(jnp.bfloat16))

    nk = Kp // tk
    grid = (Mp // tm, nk)

    # VMEM budget for this tile plan (double-buffered inputs + scratch/temps).
    vmem_est = (2 * tm * tk * 2            # x tiles (bf16)
                + 2 * tk * 1024 * 2        # w1 slice(s) (bf16)
                + 2 * 1024 * 512 * 2       # w2 (bf16)
                + tm * 1024 * 4            # f32 accumulator scratch
                + 3 * tm * 1024 * 4)       # headroom for h1/h2 temporaries
    vmem_limit = int(min(max(int(vmem_est * 1.5), 32 << 20), 48 << 20))

    flops = 2 * Mp * Kp * 1024 + 2 * Mp * 1024 * 512 + 2 * Mp * 512
    bytes_accessed = (xp.size * 2 + prep["w1"].size * 2 + prep["w2"].size * 2
                      + (1024 + 512 + 512 + 1) * 4 + Mp * 4)

    out = pl.pallas_call(
        _mlp_kernel,
        out_shape=jax.ShapeDtypeStruct((Mp, 1), jnp.float32),
        grid_spec=pltpu.PrefetchScalarGridSpec(
            num_scalar_prefetch=0,
            grid=grid,
            in_specs=[
                pl.BlockSpec((tm, tk), lambda i, k: (i, k)),       # x tile (bf16)
                pl.BlockSpec((tk, 1024), lambda i, k: (k, 0)),     # w1 (resident if nk==1)
                pl.BlockSpec((1, 1024), lambda i, k: (0, 0)),      # b1 (BN folded)
                pl.BlockSpec((1024, 512), lambda i, k: (0, 0)),    # w2 (resident)
                pl.BlockSpec((1, 512), lambda i, k: (0, 0)),       # b2
                pl.BlockSpec((1, 512), lambda i, k: (0, 0)),       # w3 row
                pl.BlockSpec((1, 1), lambda i, k: (0, 0)),         # b3
            ],
            out_specs=pl.BlockSpec((tm, 1), lambda i, k: (i, 0)),
            scratch_shapes=[pltpu.VMEM((tm, 1024), jnp.float32)],  # layer-1 acc
        ),
        compiler_params=pltpu.CompilerParams(
            dimension_semantics=("parallel", "arbitrary"),
            vmem_limit_bytes=vmem_limit),
        cost_estimate=pl.CostEstimate(
            flops=int(flops),
            transcendentals=int(Mp),
            bytes_accessed=int(bytes_accessed)),
    )(xp, prep["w1"], prep["b1"], prep["w2"], prep["b2"], prep["w3"], prep["b3"])
    return out[:B]


# ---------------------------------------------------------------------------
# Parameter init / pure-f32 reference (mirrors the PyTorch module, eval mode).
# ---------------------------------------------------------------------------
def init_params(key, input_size):
    """Shapes mirror the PyTorch module; Linear weights stored as (in, out)."""
    def linear(k, fan_in, fan_out):
        kw, kb = jax.random.split(k)
        bound = 1.0 / jnp.sqrt(fan_in)
        w = jax.random.uniform(kw, (fan_in, fan_out), jnp.float32, -bound, bound)
        b = jax.random.uniform(kb, (1, fan_out), jnp.float32, -bound, bound)
        return w, b

    k1, k2, k3, k4 = jax.random.split(key, 4)
    w1, b1 = linear(k1, input_size, 1024)
    w2, b2 = linear(k2, 1024, 512)
    w3, b3 = linear(k3, 512, 1)
    kg, kbt, km, kv = jax.random.split(k4, 4)
    return {
        # Non-trivial running stats so the BN fold is actually exercised.
        "bn_gamma": jax.random.uniform(kg, (1, input_size), jnp.float32, 0.5, 1.5),
        "bn_beta": 0.1 * jax.random.normal(kbt, (1, input_size), jnp.float32),
        "bn_mean": 0.1 * jax.random.normal(km, (1, input_size), jnp.float32),
        "bn_var": jax.random.uniform(kv, (1, input_size), jnp.float32, 0.5, 1.5),
        "w1": w1, "b1": b1,
        "w2": w2, "b2": b2,
        "w3": w3, "b3": b3,
    }


def reference_forward(x, p):
    """Pure-f32 reference of the original module (eval mode)."""
    hi = jax.lax.Precision.HIGHEST
    inv_std = jax.lax.rsqrt(p["bn_var"] + BN_EPS)
    xn = (x - p["bn_mean"]) * inv_std * p["bn_gamma"] + p["bn_beta"]
    h1 = jnp.maximum(jnp.dot(xn, p["w1"], precision=hi) + p["b1"], 0.0)
    h2 = jnp.maximum(jnp.dot(h1, p["w2"], precision=hi) + p["b2"], 0.0)
    return jax.nn.sigmoid(jnp.dot(h2, p["w3"], precision=hi) + p["b3"])


if __name__ == "__main__":
    INPUT_SIZE = 300   # small stand-in for the default 4292 (pads to 384)
    BATCH = 8

    key = jax.random.PRNGKey(0)
    kx, kp = jax.random.split(key)
    x = jax.random.normal(kx, (BATCH, INPUT_SIZE), jnp.float32)
    params = init_params(kp, INPUT_SIZE)
    ref = reference_forward(x, params)

    # Default (production) path: one-time prep, fully resident w1, single K step.
    prep = prepare_params(params)
    out = jax.block_until_ready(network_forward(x, prep))
    assert out.shape == (BATCH, 1)
    max_err = float(jnp.max(jnp.abs(out - ref)))
    # bf16 weights + bf16 activations into the MXU (f32 accumulation): loose tol.
    assert max_err < 2e-2, f"resident path mismatch: max abs err {max_err}"

    # K-streamed fallback path (exercises the K grid axis + accumulator logic).
    prep_s = prepare_params(params, tk=128)
    out_s = jax.block_until_ready(network_forward(x, prep_s))
    max_err_s = float(jnp.max(jnp.abs(out_s - ref)))
    assert max_err_s < 2e-2, f"streamed path mismatch: max abs err {max_err_s}"

    print("KERNEL_OK")
</pallas_src>

<mosaic_0001>
module attributes {stable_mosaic.version = 11 : i64} {
  func.func @_mlp_kernel(%arg0: i32, %arg1: i32, %arg2: memref<8x384xbf16, #tpu.memory_space<vmem>>, %arg3: memref<384x1024xbf16, #tpu.memory_space<vmem>>, %arg4: memref<1x1024xf32, #tpu.memory_space<vmem>>, %arg5: memref<1024x512xbf16, #tpu.memory_space<vmem>>, %arg6: memref<1x512xf32, #tpu.memory_space<vmem>>, %arg7: memref<1x512xf32, #tpu.memory_space<vmem>>, %arg8: memref<1x1xf32, #tpu.memory_space<vmem>>, %arg9: memref<8x1xf32, #tpu.memory_space<vmem>>, %arg10: memref<8x1024xf32, #tpu.memory_space<vmem>>) attributes {dimension_semantics = [#tpu.dimension_semantics<parallel>, #tpu.dimension_semantics<arbitrary>], iteration_bounds = array<i64: 1, 1>, scalar_prefetch = 0 : i64, scratch_operands = 1 : i64, tpu.core_type = #tpu.core_type<tc>, window_params = [{transform_indices = @transform_0, window_bounds = array<i64: 8, 384>}, {transform_indices = @transform_1, window_bounds = array<i64: 384, 1024>}, {pipeline_mode = #tpu.pipeline_mode<synchronous>, transform_indices = @transform_2, window_bounds = array<i64: 1, 1024>}, {pipeline_mode = #tpu.pipeline_mode<synchronous>, transform_indices = @transform_3, window_bounds = array<i64: 1024, 512>}, {pipeline_mode = #tpu.pipeline_mode<synchronous>, transform_indices = @transform_4, window_bounds = array<i64: 1, 512>}, {pipeline_mode = #tpu.pipeline_mode<synchronous>, transform_indices = @transform_5, window_bounds = array<i64: 1, 512>}, {pipeline_mode = #tpu.pipeline_mode<synchronous>, transform_indices = @transform_6, window_bounds = array<i64: 1, 1>}, {transform_indices = @transform_7, window_bounds = array<i64: 8, 1>}]} {
    %c0 = arith.constant 0 : index
    %c0_0 = arith.constant 0 : index
    %0 = vector.load %arg2[%c0, %c0_0] : memref<8x384xbf16, #tpu.memory_space<vmem>>, vector<8x384xbf16>
    %c0_1 = arith.constant 0 : index
    %c0_2 = arith.constant 0 : index
    %1 = vector.load %arg3[%c0_1, %c0_2] : memref<384x1024xbf16, #tpu.memory_space<vmem>>, vector<384x1024xbf16>
    %cst = arith.constant dense<0.000000e+00> : vector<8x1024xf32>
    %2 = tpu.matmul %0, %1, %cst {dimension_numbers = #tpu.dot_dimension_numbers<[1], [0], [0], [1], [0, 0, 1, 1], [], []>} : vector<8x384xbf16>, vector<384x1024xbf16>, vector<8x1024xf32> -> vector<8x1024xf32>
    %c0_i32 = arith.constant 0 : i32
    %3 = arith.cmpi eq, %arg1, %c0_i32 : i32
    %4 = arith.extui %3 : i1 to i32
    %c0_i32_3 = arith.constant 0 : i32
    %5 = arith.cmpi ne, %4, %c0_i32_3 : i32
    scf.if %5 {
      %c0_8 = arith.constant 0 : index
      %c0_9 = arith.constant 0 : index
      %12 = vector.load %arg10[%c0_8, %c0_9] : memref<8x1024xf32, #tpu.memory_space<vmem>>, vector<8x1024xf32>
      tpu.vector_store %arg10[%c0_8, %c0_9], %2 {strides = array<i32>} : memref<8x1024xf32, #tpu.memory_space<vmem>>, vector<8x1024xf32>,
    } else {
    }
    %c0_i32_4 = arith.constant 0 : i32
    %6 = arith.cmpi sgt, %arg1, %c0_i32_4 : i32
    %7 = arith.extui %6 : i1 to i32
    %c0_i32_5 = arith.constant 0 : i32
    %8 = arith.cmpi ne, %7, %c0_i32_5 : i32
    scf.if %8 {
      %c0_8 = arith.constant 0 : index
      %c0_9 = arith.constant 0 : index
      %12 = vector.load %arg10[%c0_8, %c0_9] : memref<8x1024xf32, #tpu.memory_space<vmem>>, vector<8x1024xf32>
      %13 = arith.addf %12, %2 : vector<8x1024xf32>
      %c0_10 = arith.constant 0 : index
      %c0_11 = arith.constant 0 : index
      %14 = vector.load %arg10[%c0_10, %c0_11] : memref<8x1024xf32, #tpu.memory_space<vmem>>, vector<8x1024xf32>
      tpu.vector_store %arg10[%c0_10, %c0_11], %13 {strides = array<i32>} : memref<8x1024xf32, #tpu.memory_space<vmem>>, vector<8x1024xf32>,
    } else {
    }
    %c0_i32_6 = arith.constant 0 : i32
    %9 = arith.cmpi eq, %arg1, %c0_i32_6 : i32
    %10 = arith.extui %9 : i1 to i32
    %c0_i32_7 = arith.constant 0 : i32
    %11 = arith.cmpi ne, %10, %c0_i32_7 : i32
    scf.if %11 {
      %c0_8 = arith.constant 0 : index
      %c0_9 = arith.constant 0 : index
      %12 = vector.load %arg10[%c0_8, %c0_9] : memref<8x1024xf32, #tpu.memory_space<vmem>>, vector<8x1024xf32>
      %c0_10 = arith.constant 0 : index
      %c0_11 = arith.constant 0 : index
      %13 = vector.load %arg4[%c0_10, %c0_11] : memref<1x1024xf32, #tpu.memory_space<vmem>>, vector<1x1024xf32>
      %14 = vector.broadcast %13 : vector<1x1024xf32> to vector<8x1024xf32>
      %15 = arith.addf %12, %14 : vector<8x1024xf32>
      %cst_12 = arith.constant 0.000000e+00 : f32
      %16 = vector.broadcast %cst_12 : f32 to vector<8x1024xf32>
      %17 = arith.maximumf %15, %16 : vector<8x1024xf32>
      %18 = arith.truncf %17 : vector<8x1024xf32> to vector<8x1024xbf16>
      %c0_13 = arith.constant 0 : index
      %c0_14 = arith.constant 0 : index
      %19 = vector.load %arg5[%c0_13, %c0_14] : memref<1024x512xbf16, #tpu.memory_space<vmem>>, vector<1024x512xbf16>
      %cst_15 = arith.constant dense<0.000000e+00> : vector<8x512xf32>
      %20 = tpu.matmul %18, %19, %cst_15 {dimension_numbers = #tpu.dot_dimension_numbers<[1], [0], [0], [1], [0, 0, 1, 1], [], []>} : vector<8x1024xbf16>, vector<1024x512xbf16>, vector<8x512xf32> -> vector<8x512xf32>
      %c0_16 = arith.constant 0 : index
      %c0_17 = arith.constant 0 : index
      %21 = vector.load %arg6[%c0_16, %c0_17] : memref<1x512xf32, #tpu.memory_space<vmem>>, vector<1x512xf32>
      %22 = vector.broadcast %21 : vector<1x512xf32> to vector<8x512xf32>
      %23 = arith.addf %20, %22 : vector<8x512xf32>
      %cst_18 = arith.constant 0.000000e+00 : f32
      %24 = vector.broadcast %cst_18 : f32 to vector<8x512xf32>
      %25 = arith.maximumf %23, %24 : vector<8x512xf32>
      %c0_19 = arith.constant 0 : index
      %c0_20 = arith.constant 0 : index
      %26 = vector.load %arg7[%c0_19, %c0_20] : memref<1x512xf32, #tpu.memory_space<vmem>>, vector<1x512xf32>
      %27 = vector.broadcast %26 : vector<1x512xf32> to vector<8x512xf32>
      %28 = arith.mulf %25, %27 : vector<8x512xf32>
      %cst_21 = arith.constant dense<0.000000e+00> : vector<8xf32>
      %29 = vector.multi_reduction <add>, %28, %cst_21 [1] : vector<8x512xf32> to vector<8xf32>
      %30 = vector.shape_cast %29 : vector<8xf32> to vector<8x1xf32>
      %c0_22 = arith.constant 0 : index
      %c0_23 = arith.constant 0 : index
      %31 = vector.load %arg8[%c0_22, %c0_23] : memref<1x1xf32, #tpu.memory_space<vmem>>, vector<1x1xf32>
      %32 = vector.broadcast %31 : vector<1x1xf32> to vector<8x1xf32>
      %33 = arith.addf %30, %32 : vector<8x1xf32>
      %34 = arith.negf %33 : vector<8x1xf32>
      %35 = math.exp %34 : vector<8x1xf32>
      %cst_24 = arith.constant 1.000000e+00 : f32
      %36 = vector.broadcast %cst_24 : f32 to vector<8x1xf32>
      %37 = arith.addf %36, %35 : vector<8x1xf32>
      %38 = arith.divf %36, %37 : vector<8x1xf32>
      %c0_25 = arith.constant 0 : index
      %c0_26 = arith.constant 0 : index
      %39 = vector.load %arg9[%c0_25, %c0_26] : memref<8x1xf32, #tpu.memory_space<vmem>>, vector<8x1xf32>
      tpu.vector_store %arg9[%c0_25, %c0_26], %38 {strides = array<i32>} : memref<8x1xf32, #tpu.memory_space<vmem>>, vector<8x1xf32>,
    } else {
    }
    return
  }
  func.func @transform_0(%arg0: i32, %arg1: i32) -> (i32, i32) {
    %c0_i32 = arith.constant 0 : i32
    return %arg0, %arg1 : i32, i32
  }
  func.func @transform_1(%arg0: i32, %arg1: i32) -> (i32, i32) {
    %c0_i32 = arith.constant 0 : i32
    %c0_i32_0 = arith.constant 0 : i32
    return %arg1, %c0_i32 : i32, i32
  }
  func.func @transform_2(%arg0: i32, %arg1: i32) -> (i32, i32) {
    %c0_i32 = arith.constant 0 : i32
    %c0_i32_0 = arith.constant 0 : i32
    %c0_i32_1 = arith.constant 0 : i32
    return %c0_i32, %c0_i32_0 : i32, i32
  }
  func.func @transform_3(%arg0: i32, %arg1: i32) -> (i32, i32) {
    %c0_i32 = arith.constant 0 : i32
    %c0_i32_0 = arith.constant 0 : i32
    %c0_i32_1 = arith.constant 0 : i32
    return %c0_i32, %c0_i32_0 : i32, i32
  }
  func.func @transform_4(%arg0: i32, %arg1: i32) -> (i32, i32) {
    %c0_i32 = arith.constant 0 : i32
    %c0_i32_0 = arith.constant 0 : i32
    %c0_i32_1 = arith.constant 0 : i32
    return %c0_i32, %c0_i32_0 : i32, i32
  }
  func.func @transform_5(%arg0: i32, %arg1: i32) -> (i32, i32) {
    %c0_i32 = arith.constant 0 : i32
    %c0_i32_0 = arith.constant 0 : i32
    %c0_i32_1 = arith.constant 0 : i32
    return %c0_i32, %c0_i32_0 : i32, i32
  }
  func.func @transform_6(%arg0: i32, %arg1: i32) -> (i32, i32) {
    %c0_i32 = arith.constant 0 : i32
    %c0_i32_0 = arith.constant 0 : i32
    %c0_i32_1 = arith.constant 0 : i32
    return %c0_i32, %c0_i32_0 : i32, i32
  }
  func.func @transform_7(%arg0: i32, %arg1: i32) -> (i32, i32) {
    %c0_i32 = arith.constant 0 : i32
    %c0_i32_0 = arith.constant 0 : i32
    return %arg0, %c0_i32 : i32, i32
  }
}

</mosaic_0001>

<bundles_post_ra>
// kernel: tpu_custom_call.1
= control target key start
LH: loop header
LB: loop body
LE: loop exit
PB: predicated region body
PF: predicated region fallthrough
CT: control target
= control target key end

     0   :  { %s4750_s0 = inlined_call_operand.hbm [shape: bf16[8,384], index: 0, kind: input, shape index: {}]   ;;  %s4751_s1 = inlined_call_operand.hbm [shape: bf16[384,1024], index: 1, kind: input, shape index: {}]   ;;  %s4752_s2 = inlined_call_operand.vmem [shape: f32[1,1024], index: 2, kind: input, shape index: {}]   ;;  %s4753_s3 = inlined_call_operand.hbm [shape: bf16[1024,512], index: 3, kind: input, shape index: {}]   ;;  %s4754_s4 = inlined_call_operand.vmem [shape: f32[1,512], index: 4, kind: input, shape index: {}]   ;;  %s4755_s5 = inlined_call_operand.vmem [shape: f32[1,512], index: 5, kind: input, shape index: {}]   ;;  %s4756_s6 = inlined_call_operand.<no memory space> [shape: f32[1,1], index: 6, kind: input, shape index: {}]   ;;  %s4757_s7 = inlined_call_operand.vmem [shape: f32[8,1], index: 7, kind: output, shape index: {}]  }
   0x1   :  { %v12_v0 = vstv %s4756_s6 }
   0x2   :  { %13 = vst [vmem:[#allocation3] sm:$0x1] %v12_v0 }
   0x3   :  { %14 = vsyncpa [#allocation5], 0 }
   0x4   :  { %15 = vsyncpa [#allocation7], 0  ;;  %s4572_s26 = smov [#allocation6]   ;;  %s4502_s30 = scalar_lea.hbm %s4751_s1, 24576 }
   0x5   :  { %s31_s27 = sshll.u32 %s4572_s26, 4  ;;  %p4503_p0 = scmp.ne.s32.totalorder %s4751_s1, %s4502_s30  ;;  %s32_s27 = int_to_ptr.vmem [resolvable:$true] %s31_s27 }
   0x6   :  { %p4506_p1 = scmp.lt.u32.totalorder %s4502_s30, %s4751_s1 }
   0x8   :  { %p4508_p2 = pnand %p4506_p1, %p4503_p0 }
   0xa   :  { %4511 = shalt.err (!%p4508_p2)
}
   0xb   :  { %s4512_s6 = scalar_lea.vmem %s32_s27, 24576  ;;  %p4517_p4 = scmp.lt.s32.totalorder %s32_s27, %s32_s27 }
   0xc   :  { %p4513_p3 = scmp.ne.s32.totalorder %s32_s27, %s4512_s6  ;;  %p4518_p5 = scmp.lt.s32.totalorder %s4512_s6, %s4512_s6 }
   0xe   :  { %p4519_p6 = por %p4518_p5, %p4517_p4 }
  0x10   :  { %p4520_p7 = pnand %p4519_p6, %p4513_p3 }
  0x12   :  { %4523 = shalt.err (!%p4520_p7)
}
  0x13   :  { %s4573_s12 = smov 512   ;;  %s4574_s13 = smov 32  }
  0x14   :  { %37 = dma.hbm_to_vmem [thread:$0]  %s4751_s1, 24576, %s32_s27, [#allocation7], %s4573_s12, %s4573_s12, %s4574_s13  }
  0x15   :  { %s4575_s16 = smov [#allocation4]   ;;  %s4576_s18 = smov [#allocation8]  }
  0x16   :  { %s22_s17 = sshll.u32 %s4575_s16, 4  ;;  %s45_s19 = sshll.u32 %s4576_s18, 4  ;;  %s23_s17 = int_to_ptr.vmem [resolvable:$true] %s22_s17  ;;  %s46_s19 = int_to_ptr.vmem [resolvable:$true] %s45_s19 }
  0x17   :  { %s4524_s22 = scalar_lea.hbm %s4750_s0, 192 }
  0x18   :  { %p4525_p8 = scmp.ne.s32.totalorder %s4750_s0, %s4524_s22  ;;  %p4528_p9 = scmp.lt.u32.totalorder %s4524_s22, %s4750_s0 }
  0x1a   :  { %p4530_p10 = pnand %p4528_p9, %p4525_p8 }
  0x1c   :  { %4533 = shalt.err (!%p4530_p10)
}
  0x1d   :  { %s4534_s1 = scalar_lea.vmem %s23_s17, 192  ;;  %p4539_p12 = scmp.lt.s32.totalorder %s23_s17, %s23_s17 }
  0x1e   :  { %p4535_p11 = scmp.ne.s32.totalorder %s23_s17, %s4534_s1  ;;  %p4540_p13 = scmp.lt.s32.totalorder %s4534_s1, %s4534_s1 }
  0x20   :  { %p4541_p0 = por %p4540_p13, %p4539_p12 }
  0x22   :  { %p4542_p1 = pnand %p4541_p0, %p4535_p11 }
  0x24   :  { %4545 = shalt.err (!%p4542_p1)
}
  0x25   :  { %25 = dma.hbm_to_vmem [thread:$0]  %s4750_s0, 192, %s23_s17, [#allocation5]  }
  0x26   :  { %s4546_s8 = scalar_lea.hbm %s4753_s3, 32768 }
  0x27   :  { %p4547_p2 = scmp.ne.s32.totalorder %s4753_s3, %s4546_s8  ;;  %p4550_p3 = scmp.lt.u32.totalorder %s4546_s8, %s4753_s3 }
  0x29   :  { %p4552_p4 = pnand %p4550_p3, %p4547_p2 }
  0x2b   :  { %4555 = shalt.err (!%p4552_p4)
}
  0x2c   :  { %s4556_s12 = scalar_lea.vmem %s46_s19, 32768  ;;  %p4561_p6 = scmp.lt.s32.totalorder %s46_s19, %s46_s19 }
  0x2d   :  { %p4557_p5 = scmp.ne.s32.totalorder %s46_s19, %s4556_s12  ;;  %p4562_p7 = scmp.lt.s32.totalorder %s4556_s12, %s4556_s12 }
  0x2f   :  { %p4563_p8 = por %p4562_p7, %p4561_p6 }
  0x31   :  { %p4564_p9 = pnand %p4563_p8, %p4557_p5 }
  0x33   :  { %4567 = shalt.err (!%p4564_p9)
}
  0x34   :  { %s4577_s0 = smov 256   ;;  %s4578_s13 = smov 16  }
  0x35   :  { %51 = dma.hbm_to_vmem [thread:$0]  %s4753_s3, 32768, %s46_s19, [#allocation7], %s4577_s0, %s4577_s0, %s4578_s13  }
  0x36   :  { %4568 = dma.done.wait [#allocation5], 192  }
  0x37   :  { %4569 = vsyncadd [#allocation5], 4294967104 }
  0x38   :  { %4570 = dma.done.wait [#allocation7], 57344  }
  0x39   :  { %4571 = vsyncadd [#allocation7], 4294909952  ;;  %v4579_v1 = vmov 0   ;;  %v70_v2 = vld [vmem:[#allocation6] sm:$0xff]  ;;  %v4660_v43 = vld [vmem:[#allocation4] sm:$0xff]  ;;  %vm3613_vm0 = vcmask 7168  }
  0x3a   :  { %1306 = vmatprep.mubr.bf16.mxu1 %v4579_v1  ;;  %v74_v3 = vld [vmem:[#allocation6 + $0x20] sm:$0xff]  ;;  %v4664_v47 = vcombine.high %v4660_v43, %v4660_v43 }
  0x3b   :  { %v78_v4 = vld [vmem:[#allocation6 + $0x40] sm:$0xff]  ;;  %v3625_v5 = vcombine.high %v70_v2, %v74_v3  ;;  %v3624_v6 = vcombine.low %v70_v2, %v74_v3 }
  0x3c   :  { %v82_v7 = vld [vmem:[#allocation6 + $0x60] sm:$0xff]  ;;  %1265 = vmatprep.mubr.bf16.mxu0 %v4664_v47 }
  0x3d   :  { %v3633_v8 = vcombine.high %v78_v4, %v82_v7  ;;  %v86_v9 = vld [vmem:[#allocation6 + $0x80] sm:$0xff]  ;;  %1233 = vmatprep.subr.bf16.mxu0 %v3625_v5  ;;  %v3632_v11 = vcombine.low %v78_v4, %v82_v7 }
  0x3e   :  { %v90_v10 = vld [vmem:[#allocation6 + $0xa0] sm:$0xff]  ;;  %1234 = vmatpush1.bf16.msra.mxu0 %v3624_v6 }
  0x3f   :  { %1235 = vmatprep.subr.bf16.mxu0 %v3633_v8  ;;  %v3641_v12 = vcombine.high %v86_v9, %v90_v10  ;;  %v198_v13 = vld [vmem:[#allocation6 + $0x400] sm:$0xff]  ;;  %v3640_v21 = vcombine.low %v86_v9, %v90_v10  ;;  %v71_v9 = vld [vmem:[#allocation6 + $0x8] sm:$0xff] }
  0x40   :  { %v202_v14 = vld [vmem:[#allocation6 + $0x420] sm:$0xff]  ;;  %v75_v10 = vld [vmem:[#allocation6 + $0x28] sm:$0xff] }
  0x41   :  { %v94_v15 = vld [vmem:[#allocation6 + $0xc0] sm:$0xff]  ;;  %v3753_v17 = vcombine.high %v198_v13, %v202_v14  ;;  %v3752_v18 = vcombine.low %v198_v13, %v202_v14 }
  0x42   :  { %v98_v16 = vld [vmem:[#allocation6 + $0xe0] sm:$0xff]  ;;  %1236 = vmatpush1.bf16.msra.mxu0 %v3632_v11 }
  0x43   :  { %v206_v19 = vld [vmem:[#allocation6 + $0x440] sm:$0xff]  ;;  %1274 = vmatprep.subr.bf16.mxu1 %v3753_v17  ;;  %1237 = vmatprep.subr.bf16.mxu0 %v3641_v12  ;;  %v3649_v25 = vcombine.high %v94_v15, %v98_v16  ;;  %v3648_v32 = vcombine.low %v94_v15, %v98_v16  ;;  %v3627_v16 = vcombine.high %v71_v9, %v75_v10  ;;  %v79_v17 = vld [vmem:[#allocation6 + $0x48] sm:$0xff] }
  0x44   :  { %v210_v20 = vld [vmem:[#allocation6 + $0x460] sm:$0xff]  ;;  %1275 = vmatpush1.bf16.msra.mxu1 %v3752_v18  ;;  %v83_v18 = vld [vmem:[#allocation6 + $0x68] sm:$0xff] }
  0x45   :  { %v3761_v22 = vcombine.high %v206_v19, %v210_v20  ;;  %v214_v23 = vld [vmem:[#allocation6 + $0x480] sm:$0xff]  ;;  %v3760_v26 = vcombine.low %v206_v19, %v210_v20  ;;  %v4667_v20 = vld [vmem:[#allocation4 + $0x8] ss:$0 sps:$4 sm:$0xff]  }
  0x46   :  { %v218_v24 = vld [vmem:[#allocation6 + $0x4a0] sm:$0xff]  ;;  %1238 = vmatpush1.bf16.msra.mxu0 %v3640_v21 }
  0x47   :  { %v102_v27 = vld [vmem:[#allocation6 + $0x100] sm:$0xff]  ;;  %1276 = vmatprep.subr.bf16.mxu1 %v3761_v22  ;;  %v3769_v29 = vcombine.high %v214_v23, %v218_v24  ;;  %1239 = vmatprep.subr.bf16.mxu0 %v3649_v25  ;;  %v3768_v34 = vcombine.low %v214_v23, %v218_v24  ;;  %v3626_v22 = vcombine.low %v71_v9, %v75_v10  ;;  %v207_v10 = vld [vmem:[#allocation6 + $0x448] sm:$0xff] }
  0x48   :  { %v106_v28 = vld [vmem:[#allocation6 + $0x120] sm:$0xff]  ;;  %1277 = vmatpush1.bf16.msra.mxu1 %v3760_v26  ;;  %v3635_v25 = vcombine.high %v79_v17, %v83_v18  ;;  %v87_v26 = vld [vmem:[#allocation6 + $0x88] sm:$0xff] }
  0x49   :  { %v222_v30 = vld [vmem:[#allocation6 + $0x4c0] sm:$0xff]  ;;  %v3657_v33 = vcombine.high %v102_v27, %v106_v28  ;;  %1278 = vmatprep.subr.bf16.mxu1 %v3769_v29  ;;  %v3656_v40 = vcombine.low %v102_v27, %v106_v28  ;;  %v91_v27 = vld [vmem:[#allocation6 + $0xa8] sm:$0xff] }
  0x4a   :  { %v226_v31 = vld [vmem:[#allocation6 + $0x4e0] sm:$0xff]  ;;  %1240 = vmatpush1.bf16.msra.mxu0 %v3648_v32 }
  0x4b   :  { %v110_v35 = vld [vmem:[#allocation6 + $0x140] sm:$0xff]  ;;  %v3777_v37 = vcombine.high %v222_v30, %v226_v31  ;;  %1241 = vmatprep.subr.bf16.mxu0 %v3657_v33  ;;  %v3776_v42 = vcombine.low %v222_v30, %v226_v31  ;;  %v3634_v30 = vcombine.low %v79_v17, %v83_v18  ;;  %v3643_v33 = vcombine.high %v87_v26, %v91_v27  ;;  %v215_v18 = vld [vmem:[#allocation6 + $0x488] sm:$0xff] }
  0x4c   :  { %v114_v36 = vld [vmem:[#allocation6 + $0x160] sm:$0xff]  ;;  %1279 = vmatpush1.bf16.msra.mxu1 %v3768_v34  ;;  %v95_v34 = vld [vmem:[#allocation6 + $0xc8] sm:$0xff] }
  0x4d   :  { %v230_v38 = vld [vmem:[#allocation6 + $0x500] sm:$0xff]  ;;  %v3665_v41 = vcombine.high %v110_v35, %v114_v36  ;;  %1280 = vmatprep.subr.bf16.mxu1 %v3777_v37  ;;  %v3664_v50 = vcombine.low %v110_v35, %v114_v36  ;;  %v99_v35 = vld [vmem:[#allocation6 + $0xe8] sm:$0xff] }
  0x4e   :  { %v234_v39 = vld [vmem:[#allocation6 + $0x520] sm:$0xff]  ;;  %1242 = vmatpush1.bf16.msra.mxu0 %v3656_v40 }
  0x4f   :  { %v118_v44 = vld [vmem:[#allocation6 + $0x180] sm:$0xff]  ;;  %v3785_v46 = vcombine.high %v230_v38, %v234_v39  ;;  %1243 = vmatprep.subr.bf16.mxu0 %v3665_v41  ;;  %v3784_v52 = vcombine.low %v230_v38, %v234_v39  ;;  %v3642_v38 = vcombine.low %v87_v26, %v91_v27  ;;  %v3651_v41 = vcombine.high %v95_v34, %v99_v35  ;;  %v227_v26 = vld [vmem:[#allocation6 + $0x4e8] sm:$0xff] }
  0x50   :  { %v122_v45 = vld [vmem:[#allocation6 + $0x1a0] sm:$0xff]  ;;  %1281 = vmatpush1.bf16.msra.mxu1 %v3776_v42  ;;  %v103_v42 = vld [vmem:[#allocation6 + $0x108] sm:$0xff] }
  0x51   :  { %v238_v48 = vld [vmem:[#allocation6 + $0x540] sm:$0xff]  ;;  %v3673_v51 = vcombine.high %v118_v44, %v122_v45  ;;  %1282 = vmatprep.subr.bf16.mxu1 %v3785_v46  ;;  %v3672_v58 = vcombine.low %v118_v44, %v122_v45  ;;  %v107_v44 = vld [vmem:[#allocation6 + $0x128] sm:$0xff] }
  0x52   :  { %v242_v49 = vld [vmem:[#allocation6 + $0x560] sm:$0xff]  ;;  %1244 = vmatpush1.bf16.msra.mxu0 %v3664_v50 }
  0x53   :  { %v126_v53 = vld [vmem:[#allocation6 + $0x1c0] sm:$0xff]  ;;  %v3793_v55 = vcombine.high %v238_v48, %v242_v49  ;;  %1245 = vmatprep.subr.bf16.mxu0 %v3673_v51  ;;  %v3792_v60 = vcombine.low %v238_v48, %v242_v49  ;;  %v3650_v48 = vcombine.low %v95_v34, %v99_v35  ;;  %v3659_v51 = vcombine.high %v103_v42, %v107_v44  ;;  %v231_v34 = vld [vmem:[#allocation6 + $0x508] sm:$0xff] }
  0x54   :  { %v130_v54 = vld [vmem:[#allocation6 + $0x1e0] sm:$0xff]  ;;  %1283 = vmatpush1.bf16.msra.mxu1 %v3784_v52  ;;  %v111_v52 = vld [vmem:[#allocation6 + $0x148] sm:$0xff] }
  0x55   :  { %v246_v56 = vld [vmem:[#allocation6 + $0x580] sm:$0xff]  ;;  %v3681_v59 = vcombine.high %v126_v53, %v130_v54  ;;  %1284 = vmatprep.subr.bf16.mxu1 %v3793_v55  ;;  %v3680_v3 = vcombine.low %v126_v53, %v130_v54  ;;  %v115_v53 = vld [vmem:[#allocation6 + $0x168] sm:$0xff] }
  0x56   :  { %v250_v57 = vld [vmem:[#allocation6 + $0x5a0] sm:$0xff]  ;;  %1246 = vmatpush1.bf16.msra.mxu0 %v3672_v58  ;;  %v235_v35 = vld [vmem:[#allocation6 + $0x528] sm:$0xff] }
  0x57   :  { %v134_v61 = vld [vmem:[#allocation6 + $0x200] sm:$0xff]  ;;  %v3801_v63 = vcombine.high %v246_v56, %v250_v57  ;;  %1247 = vmatprep.subr.bf16.mxu0 %v3681_v59  ;;  %v3800_v5 = vcombine.low %v246_v56, %v250_v57  ;;  %v3658_v56 = vcombine.low %v103_v42, %v107_v44  ;;  %v3667_v59 = vcombine.high %v111_v52, %v115_v53  ;;  %v239_v42 = vld [vmem:[#allocation6 + $0x548] sm:$0xff] }
  0x58   :  { %v138_v62 = vld [vmem:[#allocation6 + $0x220] sm:$0xff]  ;;  %1285 = vmatpush1.bf16.msra.mxu1 %v3792_v60  ;;  %v119_v60 = vld [vmem:[#allocation6 + $0x188] sm:$0xff] }
  0x59   :  { %v254_v0 = vld [vmem:[#allocation6 + $0x5c0] sm:$0xff]  ;;  %v3689_v4 = vcombine.high %v134_v61, %v138_v62  ;;  %1286 = vmatprep.subr.bf16.mxu1 %v3801_v63  ;;  %v3688_v11 = vcombine.low %v134_v61, %v138_v62  ;;  %v123_v61 = vld [vmem:[#allocation6 + $0x1a8] sm:$0xff] }
  0x5a   :  { %v258_v2 = vld [vmem:[#allocation6 + $0x5e0] sm:$0xff]  ;;  %1248 = vmatpush1.bf16.msra.mxu0 %v3680_v3  ;;  %v203_v3 = vld [vmem:[#allocation6 + $0x428] sm:$0xff]  ;;  %v3674_v9 = vcombine.low %v119_v60, %v123_v61 }
  0x5b   :  { %v142_v6 = vld [vmem:[#allocation6 + $0x240] sm:$0xff]  ;;  %v3809_v8 = vcombine.high %v254_v0, %v258_v2  ;;  %1249 = vmatprep.subr.bf16.mxu0 %v3689_v4  ;;  %v3808_v13 = vcombine.low %v254_v0, %v258_v2  ;;  %v3666_v0 = vcombine.low %v111_v52, %v115_v53  ;;  %v199_v2 = vld [vmem:[#allocation6 + $0x408] sm:$0xff]  ;;  %v3675_v4 = vcombine.high %v119_v60, %v123_v61 }
  0x5c   :  { %v146_v7 = vld [vmem:[#allocation6 + $0x260] sm:$0xff]  ;;  %1287 = vmatpush1.bf16.msra.mxu1 %v3800_v5  ;;  %v127_v5 = vld [vmem:[#allocation6 + $0x1c8] sm:$0xff] }
  0x5d   :  { %v3697_v12 = vcombine.high %v142_v6, %v146_v7  ;;  %v150_v14 = vld [vmem:[#allocation6 + $0x280] sm:$0xff]  ;;  %1288 = vmatprep.subr.bf16.mxu1 %v3809_v8  ;;  %v3696_v19 = vcombine.low %v142_v6, %v146_v7  ;;  %v131_v6 = vld [vmem:[#allocation6 + $0x1e8] sm:$0xff]  ;;  %v3755_v8 = vcombine.high %v199_v2, %v203_v3 }
  0x5e   :  { %v154_v15 = vld [vmem:[#allocation6 + $0x2a0] sm:$0xff]  ;;  %1250 = vmatpush1.bf16.msra.mxu0 %v3688_v11  ;;  %v211_v11 = vld [vmem:[#allocation6 + $0x468] sm:$0xff] }
  0x5f   :  { %1251 = vmatprep.subr.bf16.mxu0 %v3697_v12  ;;  %v3705_v21 = vcombine.high %v150_v14, %v154_v15  ;;  %v158_v23 = vld [vmem:[#allocation6 + $0x2c0] sm:$0xff]  ;;  %v3704_v28 = vcombine.low %v150_v14, %v154_v15  ;;  %v3683_v12 = vcombine.high %v127_v5, %v131_v6  ;;  %v135_v14 = vld [vmem:[#allocation6 + $0x208] sm:$0xff]  ;;  %v3763_v17 = vcombine.high %v207_v10, %v211_v11 }
  0x60   :  { %1289 = vmatpush1.bf16.msra.mxu1 %v3808_v13  ;;  %v162_v24 = vld [vmem:[#allocation6 + $0x2e0] sm:$0xff]  ;;  %v4673_v13 = vcombine.low %v4660_v43, %v4660_v43  ;;  %v139_v15 = vld [vmem:[#allocation6 + $0x228] sm:$0xff] }
  0x61   :  { %1315 = vmatprep.subr.bf16.mxu1 %v3627_v16  ;;  %v3713_v29 = vcombine.high %v158_v23, %v162_v24  ;;  %v166_v31 = vld [vmem:[#allocation6 + $0x300] sm:$0xff]  ;;  %v3712_v36 = vcombine.low %v158_v23, %v162_v24  ;;  %v3754_v16 = vcombine.low %v199_v2, %v203_v3  ;;  %v3691_v23 = vcombine.high %v135_v14, %v139_v15  ;;  %v147_v24 = vld [vmem:[#allocation6 + $0x268] sm:$0xff] }
  0x62   :  { %1252 = vmatpush1.bf16.msra.mxu0 %v3696_v19  ;;  %v170_v32 = vld [vmem:[#allocation6 + $0x320] sm:$0xff]  ;;  %v219_v19 = vld [vmem:[#allocation6 + $0x4a8] sm:$0xff] }
  0x63   :  { %1307 = vmatmul.mubr.bf16.vlgmr.msra.gmra.mrb[0].mxu1 %v4667_v20  ;;  %1253 = vmatprep.subr.bf16.mxu0 %v3705_v21  ;;  %v3721_v37 = vcombine.high %v166_v31, %v170_v32  ;;  %v174_v39 = vld [vmem:[#allocation6 + $0x340] sm:$0xff]  ;;  %v3720_v45 = vcombine.low %v166_v31, %v170_v32  ;;  %v3682_v21 = vcombine.low %v127_v5, %v131_v6  ;;  %v223_v43 = vld [vmem:[#allocation6 + $0x4c8] sm:$0xff]  ;;  %v72_v5 = vld [vmem:[#allocation6 + $0x10] sm:$0xff] }
  0x64   :  { %1316 = vmatpush1.bf16.msra.mxu1 %v3626_v22  ;;  %1347 = vmatprep.mubr.bf16.mxu1 %v4664_v47  ;;  %v178_v40 = vld [vmem:[#allocation6 + $0x360] sm:$0xff]  ;;  %v143_v22 = vld [vmem:[#allocation6 + $0x248] sm:$0xff]  ;;  %v3771_v27 = vcombine.high %v215_v18, %v219_v19  ;;  %v3770_v32 = vcombine.low %v215_v18, %v219_v19  ;;  %v76_v6 = vld [vmem:[#allocation6 + $0x30] sm:$0xff] }
  0x65   :  { %1317 = vmatprep.subr.bf16.mxu1 %v3635_v25  ;;  %v3729_v46 = vcombine.high %v174_v39, %v178_v40  ;;  %v182_v49 = vld [vmem:[#allocation6 + $0x380] sm:$0xff]  ;;  %v3728_v54 = vcombine.low %v174_v39, %v178_v40  ;;  %v3762_v25 = vcombine.low %v207_v10, %v211_v11  ;;  %v3699_v31 = vcombine.high %v143_v22, %v147_v24  ;;  %v163_v39 = vld [vmem:[#allocation6 + $0x2e8] sm:$0xff]  ;;  %v204_v19 = vld [vmem:[#allocation6 + $0x430] sm:$0xff] }
  0x66   :  { %1254 = vmatpush1.bf16.msra.mxu0 %v3704_v28  ;;  %v186_v50 = vld [vmem:[#allocation6 + $0x3a0] sm:$0xff]  ;;  %v3690_v28 = vcombine.low %v135_v14, %v139_v15  ;;  %v3778_v40 = vcombine.low %v223_v43, %v227_v26  ;;  %v243_v44 = vld [vmem:[#allocation6 + $0x568] sm:$0xff]  ;;  %v80_v14 = vld [vmem:[#allocation6 + $0x50] sm:$0xff] }
  0x67   :  { %1255 = vmatprep.subr.bf16.mxu0 %v3713_v29  ;;  %v3737_v55 = vcombine.high %v182_v49, %v186_v50  ;;  %v190_v57 = vld [vmem:[#allocation6 + $0x3c0] sm:$0xff]  ;;  %v3736_v62 = vcombine.low %v182_v49, %v186_v50  ;;  %v151_v29 = vld [vmem:[#allocation6 + $0x288] sm:$0xff]  ;;  %v3786_v50 = vcombine.low %v231_v34, %v235_v35  ;;  %v84_v15 = vld [vmem:[#allocation6 + $0x70] sm:$0xff] }
  0x68   :  { %1318 = vmatpush1.bf16.msra.mxu1 %v3634_v30  ;;  %v194_v58 = vld [vmem:[#allocation6 + $0x3e0] sm:$0xff]  ;;  %v155_v30 = vld [vmem:[#allocation6 + $0x2a8] sm:$0xff] }
  0x69   :  { %1319 = vmatprep.subr.bf16.mxu1 %v3643_v33  ;;  %v3745_v63 = vcombine.high %v190_v57, %v194_v58  ;;  %v3744_v7 = vcombine.low %v190_v57, %v194_v58  ;;  %v3779_v33 = vcombine.high %v223_v43, %v227_v26  ;;  %v171_v49 = vld [vmem:[#allocation6 + $0x328] sm:$0xff]  ;;  %v3794_v58 = vcombine.low %v239_v42, %v243_v44  ;;  %v208_v43 = vld [vmem:[#allocation6 + $0x450] sm:$0xff] }
  0x6a   :  { %1256 = vmatpush1.bf16.msra.mxu0 %v3712_v36  ;;  %v3698_v36 = vcombine.low %v143_v22, %v147_v24  ;;  %v247_v52 = vld [vmem:[#allocation6 + $0x588] sm:$0xff]  ;;  %v3637_v22 = vcombine.high %v80_v14, %v84_v15  ;;  %v92_v24 = vld [vmem:[#allocation6 + $0xb0] sm:$0xff] }
  0x6b   :  { %1257 = vmatprep.subr.bf16.mxu0 %v3721_v37  ;;  %v3707_v37 = vcombine.high %v151_v29, %v155_v30  ;;  %v251_v53 = vld [vmem:[#allocation6 + $0x5a8] sm:$0xff] }
  0x6c   :  { %1320 = vmatpush1.bf16.msra.mxu1 %v3642_v38  ;;  %v159_v38 = vld [vmem:[#allocation6 + $0x2c8] sm:$0xff]  ;;  %v3802_v3 = vcombine.low %v247_v52, %v251_v53 }
  0x6d   :  { %1321 = vmatprep.subr.bf16.mxu1 %v3651_v41  ;;  %v3787_v41 = vcombine.high %v231_v34, %v235_v35  ;;  %v179_v57 = vld [vmem:[#allocation6 + $0x368] sm:$0xff]  ;;  %v220_v35 = vld [vmem:[#allocation6 + $0x4b0] sm:$0xff] }
  0x6e   :  { %1258 = vmatpush1.bf16.msra.mxu0 %v3720_v45  ;;  %v3706_v45 = vcombine.low %v151_v29, %v155_v30  ;;  %v255_v60 = vld [vmem:[#allocation6 + $0x5c8] sm:$0xff]  ;;  %v96_v30 = vld [vmem:[#allocation6 + $0xd0] sm:$0xff] }
  0x6f   :  { %1259 = vmatprep.subr.bf16.mxu0 %v3729_v46  ;;  %v167_v46 = vld [vmem:[#allocation6 + $0x308] sm:$0xff] }
  0x70   :  { %1322 = vmatpush1.bf16.msra.mxu1 %v3650_v48  ;;  %v3715_v48 = vcombine.high %v159_v38, %v163_v39  ;;  %v259_v61 = vld [vmem:[#allocation6 + $0x5e8] sm:$0xff] }
  0x71   :  { %1323 = vmatprep.subr.bf16.mxu1 %v3659_v51  ;;  %v3795_v51 = vcombine.high %v239_v42, %v243_v44  ;;  %v187_v2 = vld [vmem:[#allocation6 + $0x3a8] sm:$0xff]  ;;  %v3810_v11 = vcombine.low %v255_v60, %v259_v61  ;;  %v228_v44 = vld [vmem:[#allocation6 + $0x4f0] sm:$0xff] }
  0x72   :  { %1260 = vmatpush1.bf16.msra.mxu0 %v3728_v54  ;;  %v3714_v54 = vcombine.low %v159_v38, %v163_v39  ;;  %v195_v10 = vld [vmem:[#allocation6 + $0x3e8] sm:$0xff]  ;;  %v104_v38 = vld [vmem:[#allocation6 + $0x110] sm:$0xff] }
  0x73   :  { %1261 = vmatprep.subr.bf16.mxu0 %v3737_v55  ;;  %v175_v55 = vld [vmem:[#allocation6 + $0x348] sm:$0xff]  ;;  %v108_v39 = vld [vmem:[#allocation6 + $0x130] sm:$0xff] }
  0x74   :  { %1324 = vmatpush1.bf16.msra.mxu1 %v3658_v56  ;;  %v3723_v56 = vcombine.high %v167_v46, %v171_v49 }
  0x75   :  { %1325 = vmatprep.subr.bf16.mxu1 %v3667_v59  ;;  %v3803_v59 = vcombine.high %v247_v52, %v251_v53  ;;  %v236_v53 = vld [vmem:[#allocation6 + $0x530] sm:$0xff] }
  0x76   :  { %1262 = vmatpush1.bf16.msra.mxu0 %v3736_v62  ;;  %v3722_v62 = vcombine.low %v167_v46, %v171_v49  ;;  %v3661_v46 = vcombine.high %v104_v38, %v108_v39  ;;  %v116_v49 = vld [vmem:[#allocation6 + $0x170] sm:$0xff] }
  0x77   :  { %1263 = vmatprep.subr.bf16.mxu0 %v3745_v63  ;;  %v183_v63 = vld [vmem:[#allocation6 + $0x388] sm:$0xff] }
  0x78   :  { %1326 = vmatpush1.bf16.msra.mxu1 %v3666_v0  ;;  %v3731_v0 = vcombine.high %v175_v55, %v179_v57 }
  0x79   :  { %1327 = vmatprep.subr.bf16.mxu1 %v3675_v4  ;;  %v3811_v4 = vcombine.high %v255_v60, %v259_v61  ;;  %v244_v61 = vld [vmem:[#allocation6 + $0x570] sm:$0xff] }
  0x7a   :  { %1264 = vmatpush1.bf16.msra.mxu0 %v3744_v7  ;;  %v3730_v7 = vcombine.low %v175_v55, %v179_v57  ;;  %v124_v57 = vld [vmem:[#allocation6 + $0x1b0] sm:$0xff] }
  0x7b   :  { %1356 = vmatprep.subr.bf16.mxu0 %v3755_v8  ;;  %v191_v8 = vld [vmem:[#allocation6 + $0x3c8] sm:$0xff] }
  0x7c   :  { %1328 = vmatpush1.bf16.msra.mxu1 %v3674_v9  ;;  %v3739_v9 = vcombine.high %v183_v63, %v187_v2  ;;  %v3747_v18 = vcombine.high %v191_v8, %v195_v10 }
  0x7d   :  { %1329 = vmatprep.subr.bf16.mxu1 %v3683_v12  ;;  %1266 = vmatmul.mubr.bf16.vlgmr.msra.gmra.mrb[0].mxu0 %v4673_v13  ;;  %v3629_v12 = vcombine.high %v72_v5, %v76_v6 }
  0x7e   :  { %1357 = vmatpush1.bf16.msra.mxu0 %v3754_v16  ;;  %1388 = vmatprep.mubr.bf16.mxu0 %v4579_v1  ;;  %v3738_v16 = vcombine.low %v183_v63, %v187_v2  ;;  %v132_v2 = vld [vmem:[#allocation6 + $0x1f0] sm:$0xff] }
  0x7f   :  { %1358 = vmatprep.subr.bf16.mxu0 %v3763_v17  ;;  %v200_v17 = vld [vmem:[#allocation6 + $0x410] sm:$0xff] }
  0x80   :  { %1330 = vmatpush1.bf16.msra.mxu1 %v3682_v21  ;;  %v3628_v21 = vcombine.low %v72_v5, %v76_v6  ;;  %v3757_v26 = vcombine.high %v200_v17, %v204_v19  ;;  %v252_v6 = vld [vmem:[#allocation6 + $0x5b0] sm:$0xff] }
  0x81   :  { %1331 = vmatprep.subr.bf16.mxu1 %v3691_v23  ;;  %v88_v23 = vld [vmem:[#allocation6 + $0x90] sm:$0xff] }
  0x82   :  { %1359 = vmatpush1.bf16.msra.mxu0 %v3762_v25  ;;  %v3746_v25 = vcombine.low %v191_v8, %v195_v10  ;;  %v3645_v29 = vcombine.high %v88_v23, %v92_v24  ;;  %v136_v8 = vld [vmem:[#allocation6 + $0x210] sm:$0xff] }
  0x83   :  { %1360 = vmatprep.subr.bf16.mxu0 %v3771_v27  ;;  %v212_v27 = vld [vmem:[#allocation6 + $0x470] sm:$0xff] }
  0x84   :  { %1332 = vmatpush1.bf16.msra.mxu1 %v3690_v28  ;;  %v3636_v28 = vcombine.low %v80_v14, %v84_v15  ;;  %v3765_v34 = vcombine.high %v208_v43, %v212_v27  ;;  %v260_v14 = vld [vmem:[#allocation6 + $0x5f0] sm:$0xff] }
  0x85   :  { %1333 = vmatprep.subr.bf16.mxu1 %v3699_v31  ;;  %v100_v31 = vld [vmem:[#allocation6 + $0xf0] sm:$0xff] }
  0x86   :  { %1361 = vmatpush1.bf16.msra.mxu0 %v3770_v32  ;;  %v3756_v32 = vcombine.low %v200_v17, %v204_v19  ;;  %v144_v17 = vld [vmem:[#allocation6 + $0x250] sm:$0xff] }
  0x87   :  { %1362 = vmatprep.subr.bf16.mxu0 %v3779_v33  ;;  %v216_v33 = vld [vmem:[#allocation6 + $0x490] sm:$0xff] }
  0x88   :  { %1334 = vmatpush1.bf16.msra.mxu1 %v3698_v36  ;;  %v3644_v36 = vcombine.low %v88_v23, %v92_v24  ;;  %v3773_v42 = vcombine.high %v216_v33, %v220_v35  ;;  %v77_v23 = vld [vmem:[#allocation6 + $0x38] sm:$0xff] }
  0x89   :  { %1335 = vmatprep.subr.bf16.mxu1 %v3707_v37  ;;  %v3653_v37 = vcombine.high %v96_v30, %v100_v31 }
  0x8a   :  { %1363 = vmatpush1.bf16.msra.mxu0 %v3778_v40  ;;  %v3764_v40 = vcombine.low %v208_v43, %v212_v27  ;;  %v152_v43 = vld [vmem:[#allocation6 + $0x290] sm:$0xff] }
  0x8b   :  { %1364 = vmatprep.subr.bf16.mxu0 %v3787_v41  ;;  %v224_v41 = vld [vmem:[#allocation6 + $0x4d0] sm:$0xff] }
  0x8c   :  { %1336 = vmatpush1.bf16.msra.mxu1 %v3706_v45  ;;  %v3652_v45 = vcombine.low %v96_v30, %v100_v31  ;;  %v3781_v52 = vcombine.high %v224_v41, %v228_v44  ;;  %v85_v30 = vld [vmem:[#allocation6 + $0x78] sm:$0xff] }
  0x8d   :  { %1337 = vmatprep.subr.bf16.mxu1 %v3715_v48  ;;  %v112_v48 = vld [vmem:[#allocation6 + $0x150] sm:$0xff] }
  0x8e   :  { %1365 = vmatpush1.bf16.msra.mxu0 %v3786_v50  ;;  %v3772_v50 = vcombine.low %v216_v33, %v220_v35  ;;  %v3669_v55 = vcombine.high %v112_v48, %v116_v49  ;;  %v160_v33 = vld [vmem:[#allocation6 + $0x2d0] sm:$0xff] }
  0x8f   :  { %1366 = vmatprep.subr.bf16.mxu0 %v3795_v51  ;;  %v232_v51 = vld [vmem:[#allocation6 + $0x510] sm:$0xff] }
  0x90   :  { %1338 = vmatpush1.bf16.msra.mxu1 %v3714_v54  ;;  %v3660_v54 = vcombine.low %v104_v38, %v108_v39  ;;  %v3789_v60 = vcombine.high %v232_v51, %v236_v53  ;;  %v93_v38 = vld [vmem:[#allocation6 + $0xb8] sm:$0xff] }
  0x91   :  { %1339 = vmatprep.subr.bf16.mxu1 %v3723_v56  ;;  %v120_v56 = vld [vmem:[#allocation6 + $0x190] sm:$0xff] }
  0x92   :  { %1367 = vmatpush1.bf16.msra.mxu0 %v3794_v58  ;;  %v3780_v58 = vcombine.low %v224_v41, %v228_v44  ;;  %v3677_v63 = vcombine.high %v120_v56, %v124_v57  ;;  %v168_v41 = vld [vmem:[#allocation6 + $0x310] sm:$0xff] }
  0x93   :  { %1368 = vmatprep.subr.bf16.mxu0 %v3803_v59  ;;  %v240_v59 = vld [vmem:[#allocation6 + $0x550] sm:$0xff] }
  0x94   :  { %1340 = vmatpush1.bf16.msra.mxu1 %v3722_v62  ;;  %v3668_v62 = vcombine.low %v112_v48, %v116_v49  ;;  %v3797_v5 = vcombine.high %v240_v59, %v244_v61  ;;  %v101_v48 = vld [vmem:[#allocation6 + $0xf8] sm:$0xff] }
  0x95   :  { %1341 = vmatprep.subr.bf16.mxu1 %v3731_v0  ;;  %v128_v0 = vld [vmem:[#allocation6 + $0x1d0] sm:$0xff] }
  0x96   :  { %1369 = vmatpush1.bf16.msra.mxu0 %v3802_v3  ;;  %v3788_v3 = vcombine.low %v232_v51, %v236_v53  ;;  %v3685_v10 = vcombine.high %v128_v0, %v132_v2  ;;  %v176_v51 = vld [vmem:[#allocation6 + $0x350] sm:$0xff] }
  0x97   :  { %1370 = vmatprep.subr.bf16.mxu0 %v3811_v4  ;;  %v248_v4 = vld [vmem:[#allocation6 + $0x590] sm:$0xff] }
  0x98   :  { %1342 = vmatpush1.bf16.msra.mxu1 %v3730_v7  ;;  %v3676_v7 = vcombine.low %v120_v56, %v124_v57  ;;  %v3805_v15 = vcombine.high %v248_v4, %v252_v6 }
  0x99   :  { %1343 = vmatprep.subr.bf16.mxu1 %v3739_v9  ;;  %v140_v9 = vld [vmem:[#allocation6 + $0x230] sm:$0xff] }
  0x9a   :  { %1371 = vmatpush1.bf16.msra.mxu0 %v3810_v11  ;;  %v3796_v11 = vcombine.low %v240_v59, %v244_v61  ;;  %v3693_v19 = vcombine.high %v136_v8, %v140_v9  ;;  %v188_v59 = vld [vmem:[#allocation6 + $0x3b0] sm:$0xff]  ;;  %v113_v61 = vld [vmem:[#allocation6 + $0x158] sm:$0xff] }
  0x9b   :  { %1397 = vmatprep.subr.bf16.mxu0 %v3629_v12  ;;  %v256_v12 = vld [vmem:[#allocation6 + $0x5d0] sm:$0xff] }
  0x9c   :  { %1344 = vmatpush1.bf16.msra.mxu1 %v3738_v16  ;;  %v3684_v16 = vcombine.low %v128_v0, %v132_v2  ;;  %v3813_v24 = vcombine.high %v256_v12, %v260_v14 }
  0x9d   :  { %1345 = vmatprep.subr.bf16.mxu1 %v3747_v18  ;;  %1389 = vmatmul.mubr.bf16.vlgmr.msra.gmra.mrb[4].mxu0 %v4667_v20  ;;  %v148_v18 = vld [vmem:[#allocation6 + $0x270] sm:$0xff] }
  0x9e   :  { %1398 = vmatpush1.bf16.msra.mxu0 %v3628_v21  ;;  %1429 = vmatprep.mubr.bf16.mxu0 %v4664_v47  ;;  %v3804_v21 = vcombine.low %v248_v4, %v252_v6  ;;  %v3701_v27 = vcombine.high %v144_v17, %v148_v18  ;;  %v192_v4 = vld [vmem:[#allocation6 + $0x3d0] sm:$0xff] }
  0x9f   :  { %1399 = vmatprep.subr.bf16.mxu0 %v3637_v22  ;;  %v73_v22 = vld [vmem:[#allocation6 + $0x18] sm:$0xff] }
  0xa0   :  { %1346 = vmatpush1.bf16.msra.mxu1 %v3746_v25  ;;  %v3692_v25 = vcombine.low %v136_v8, %v140_v9  ;;  %v3631_v31 = vcombine.high %v73_v22, %v77_v23  ;;  %v125_v8 = vld [vmem:[#allocation6 + $0x1b8] sm:$0xff] }
  0xa1   :  { %1438 = vmatprep.subr.bf16.mxu1 %v3757_v26  ;;  %v156_v26 = vld [vmem:[#allocation6 + $0x2b0] sm:$0xff] }
  0xa2   :  { %1400 = vmatpush1.bf16.msra.mxu0 %v3636_v28  ;;  %v3812_v28 = vcombine.low %v256_v12, %v260_v14  ;;  %v3709_v35 = vcombine.high %v152_v43, %v156_v26  ;;  %v201_v14 = vld [vmem:[#allocation6 + $0x418] sm:$0xff] }
  0xa3   :  { %1348 = vmatmul.mubr.bf16.vlgmr.msra.gmra.mrb[4].mxu1 %v4673_v13  ;;  %1401 = vmatprep.subr.bf16.mxu0 %v3645_v29  ;;  %v81_v29 = vld [vmem:[#allocation6 + $0x58] sm:$0xff] }
  0xa4   :  { %1439 = vmatpush1.bf16.msra.mxu1 %v3756_v32  ;;  %1470 = vmatprep.mubr.bf16.mxu1 %v4579_v1  ;;  %v3700_v32 = vcombine.low %v144_v17, %v148_v18  ;;  %v3639_v39 = vcombine.high %v81_v29, %v85_v30  ;;  %v133_v17 = vld [vmem:[#allocation6 + $0x1f8] sm:$0xff] }
  0xa5   :  { %1440 = vmatprep.subr.bf16.mxu1 %v3765_v34  ;;  %v164_v34 = vld [vmem:[#allocation6 + $0x2f0] sm:$0xff] }
  0xa6   :  { %1402 = vmatpush1.bf16.msra.mxu0 %v3644_v36  ;;  %v3630_v36 = vcombine.low %v73_v22, %v77_v23  ;;  %v3717_v44 = vcombine.high %v160_v33, %v164_v34  ;;  %v209_v23 = vld [vmem:[#allocation6 + $0x458] sm:$0xff] }
  0xa7   :  { %1403 = vmatprep.subr.bf16.mxu0 %v3653_v37  ;;  %v89_v37 = vld [vmem:[#allocation6 + $0x98] sm:$0xff] }
  0xa8   :  { %1441 = vmatpush1.bf16.msra.mxu1 %v3764_v40  ;;  %v3708_v40 = vcombine.low %v152_v43, %v156_v26  ;;  %v3647_v49 = vcombine.high %v89_v37, %v93_v38  ;;  %v141_v43 = vld [vmem:[#allocation6 + $0x238] sm:$0xff] }
  0xa9   :  { %1442 = vmatprep.subr.bf16.mxu1 %v3773_v42  ;;  %v172_v42 = vld [vmem:[#allocation6 + $0x330] sm:$0xff] }
  0xaa   :  { %1404 = vmatpush1.bf16.msra.mxu0 %v3652_v45  ;;  %v3638_v45 = vcombine.low %v81_v29, %v85_v30  ;;  %v3725_v53 = vcombine.high %v168_v41, %v172_v42  ;;  %v3724_v57 = vcombine.low %v168_v41, %v172_v42  ;;  %v217_v30 = vld [vmem:[#allocation6 + $0x498] sm:$0xff] }
  0xab   :  { %1405 = vmatprep.subr.bf16.mxu0 %v3661_v46  ;;  %v97_v46 = vld [vmem:[#allocation6 + $0xd8] sm:$0xff] }
  0xac   :  { %1443 = vmatpush1.bf16.msra.mxu1 %v3772_v50  ;;  %v3716_v50 = vcombine.low %v160_v33, %v164_v34  ;;  %v3655_v56 = vcombine.high %v97_v46, %v101_v48  ;;  %v149_v33 = vld [vmem:[#allocation6 + $0x278] sm:$0xff] }
  0xad   :  { %1444 = vmatprep.subr.bf16.mxu1 %v3781_v52  ;;  %v180_v52 = vld [vmem:[#allocation6 + $0x370] sm:$0xff]  ;;  %v157_v41 = vld [vmem:[#allocation6 + $0x2b8] sm:$0xff] }
  0xae   :  { %1406 = vmatpush1.bf16.msra.mxu0 %v3660_v54  ;;  %v3646_v54 = vcombine.low %v89_v37, %v93_v38  ;;  %v3732_v0 = vcombine.low %v176_v51, %v180_v52  ;;  %v225_v38 = vld [vmem:[#allocation6 + $0x4d8] sm:$0xff] }
  0xaf   :  { %1407 = vmatprep.subr.bf16.mxu0 %v3669_v55  ;;  %v105_v55 = vld [vmem:[#allocation6 + $0x118] sm:$0xff] }
  0xb0   :  { %1445 = vmatpush1.bf16.msra.mxu1 %v3780_v58  ;;  %v184_v58 = vld [vmem:[#allocation6 + $0x390] sm:$0xff] }
  0xb1   :  { %1446 = vmatprep.subr.bf16.mxu1 %v3789_v60  ;;  %v3733_v60 = vcombine.high %v176_v51, %v180_v52  ;;  %v3741_v2 = vcombine.high %v184_v58, %v188_v59  ;;  %v3740_v9 = vcombine.low %v184_v58, %v188_v59 }
  0xb2   :  { %1408 = vmatpush1.bf16.msra.mxu0 %v3668_v62  ;;  %v117_v62 = vld [vmem:[#allocation6 + $0x178] sm:$0xff] }
  0xb3   :  { %1409 = vmatprep.subr.bf16.mxu0 %v3677_v63  ;;  %v3671_v6 = vcombine.high %v113_v61, %v117_v62 }
  0xb4   :  { %1447 = vmatpush1.bf16.msra.mxu1 %v3788_v3 }
  0xb5   :  { %1448 = vmatprep.subr.bf16.mxu1 %v3797_v5  ;;  %v196_v5 = vld [vmem:[#allocation6 + $0x3f0] sm:$0xff] }
  0xb6   :  { %1410 = vmatpush1.bf16.msra.mxu0 %v3676_v7  ;;  %v121_v7 = vld [vmem:[#allocation6 + $0x198] sm:$0xff]  ;;  %v3748_v18 = vcombine.low %v192_v4, %v196_v5 }
  0xb7   :  { %1411 = vmatprep.subr.bf16.mxu0 %v3685_v10  ;;  %v3749_v10 = vcombine.high %v192_v4, %v196_v5  ;;  %v3679_v12 = vcombine.high %v121_v7, %v125_v8 }
  0xb8   :  { %1449 = vmatpush1.bf16.msra.mxu1 %v3796_v11  ;;  %v3670_v11 = vcombine.low %v113_v61, %v117_v62  ;;  %v249_v61 = vld [vmem:[#allocation6 + $0x598] sm:$0xff] }
  0xb9   :  { %1450 = vmatprep.subr.bf16.mxu1 %v3805_v15  ;;  %v205_v15 = vld [vmem:[#allocation6 + $0x438] sm:$0xff] }
  0xba   :  { %1412 = vmatpush1.bf16.msra.mxu0 %v3684_v16  ;;  %v129_v16 = vld [vmem:[#allocation6 + $0x1d8] sm:$0xff]  ;;  %v3758_v26 = vcombine.low %v201_v14, %v205_v15 }
  0xbb   :  { %1413 = vmatprep.subr.bf16.mxu0 %v3693_v19  ;;  %v3678_v19 = vcombine.low %v121_v7, %v125_v8  ;;  %v3687_v22 = vcombine.high %v129_v16, %v133_v17  ;;  %v253_v62 = vld [vmem:[#allocation6 + $0x5b8] sm:$0xff] }
  0xbc   :  { %1451 = vmatpush1.bf16.msra.mxu1 %v3804_v21  ;;  %v3759_v21 = vcombine.high %v201_v14, %v205_v15  ;;  %v3807_v4 = vcombine.high %v249_v61, %v253_v62  ;;  %v261_v7 = vld [vmem:[#allocation6 + $0x5f8] sm:$0xff] }
  0xbd   :  { %1452 = vmatprep.subr.bf16.mxu1 %v3813_v24  ;;  %v213_v24 = vld [vmem:[#allocation6 + $0x478] sm:$0xff] }
  0xbe   :  { %1414 = vmatpush1.bf16.msra.mxu0 %v3692_v25  ;;  %v137_v25 = vld [vmem:[#allocation6 + $0x218] sm:$0xff]  ;;  %v3766_v34 = vcombine.low %v209_v23, %v213_v24 }
  0xbf   :  { %1415 = vmatprep.subr.bf16.mxu0 %v3701_v27  ;;  %v3686_v27 = vcombine.low %v129_v16, %v133_v17  ;;  %v3695_v29 = vcombine.high %v137_v25, %v141_v43  ;;  %v185_v8 = vld [vmem:[#allocation6 + $0x398] sm:$0xff] }
  0xc0   :  { %1453 = vmatpush1.bf16.msra.mxu1 %v3812_v28  ;;  %v3767_v28 = vcombine.high %v209_v23, %v213_v24  ;;  %v193_v15 = vld [vmem:[#allocation6 + $0x3d8] sm:$0xff]  ;;  %v4121_v24 = vld [vmem:[#allocation8 + $0x24] ss:$16 sps:$4 sm:$0xff]  }
  0xc1   :  { %1479 = vmatprep.subr.bf16.mxu1 %v3631_v31  ;;  %v221_v31 = vld [vmem:[#allocation6 + $0x4b8] sm:$0xff] }
  0xc2   :  { %1416 = vmatpush1.bf16.msra.mxu0 %v3700_v32  ;;  %v145_v32 = vld [vmem:[#allocation6 + $0x258] sm:$0xff]  ;;  %v3774_v42 = vcombine.low %v217_v30, %v221_v31 }
  0xc3   :  { %1471 = vmatmul.mubr.bf16.vlgmr.msra.gmra.mrb[8].mxu1 %v4667_v20  ;;  %1417 = vmatprep.subr.bf16.mxu0 %v3709_v35  ;;  %v109_v20 = vld [vmem:[#allocation6 + $0x138] sm:$0xff]  ;;  %v3694_v35 = vcombine.low %v137_v25, %v141_v43  ;;  %v3703_v37 = vcombine.high %v145_v32, %v149_v33 }
  0xc4   :  { %1480 = vmatpush1.bf16.msra.mxu1 %v3630_v36  ;;  %1511 = vmatprep.mubr.bf16.mxu1 %v4664_v47  ;;  %v3654_v47 = vcombine.low %v97_v46, %v101_v48  ;;  %v3663_v63 = vcombine.high %v105_v55, %v109_v20  ;;  %v3662_v3 = vcombine.low %v105_v55, %v109_v20  ;;  %v233_v48 = vld [vmem:[#allocation6 + $0x518] sm:$0xff] }
  0xc5   :  { %1481 = vmatprep.subr.bf16.mxu1 %v3639_v39  ;;  %v3775_v36 = vcombine.high %v217_v30, %v221_v31  ;;  %v229_v39 = vld [vmem:[#allocation6 + $0x4f8] sm:$0xff]  ;;  %v4125_v30 = vld [vmem:[#allocation8 + $0x40] ss:$16 sps:$4 sm:$0xff]  }
  0xc6   :  { %1418 = vmatpush1.bf16.msra.mxu0 %v3708_v40  ;;  %v153_v40 = vld [vmem:[#allocation6 + $0x298] sm:$0xff]  ;;  %v3782_v51 = vcombine.low %v225_v38, %v229_v39 }
  0xc7   :  { %1419 = vmatprep.subr.bf16.mxu0 %v3717_v44  ;;  %v3702_v44 = vcombine.low %v145_v32, %v149_v33  ;;  %v3711_v46 = vcombine.high %v153_v40, %v157_v41  ;;  %v3710_v52 = vcombine.low %v153_v40, %v157_v41  ;;  %v241_v55 = vld [vmem:[#allocation6 + $0x558] sm:$0xff]  ;;  %v4133_v32 = vld [vmem:[#allocation8 + $0x64] ss:$16 sps:$4 sm:$0xff]   ;;  %v4143_v41 = vld [vmem:[#allocation8 + $0xa0] ss:$16 sps:$4 sm:$0xff]  }
  0xc8   :  { %1482 = vmatpush1.bf16.msra.mxu1 %v3638_v45  ;;  %v3783_v45 = vcombine.high %v225_v38, %v229_v39  ;;  %v245_v20 = vld [vmem:[#allocation6 + $0x578] sm:$0xff]  ;;  %v4137_v38 = vld [vmem:[#allocation8 + $0x80] ss:$16 sps:$4 sm:$0xff]   ;;  %v4145_v39 = vld [vmem:[#allocation8 + $0xa4] ss:$16 sps:$4 sm:$0xff]  }
  0xc9   :  { %1483 = vmatprep.subr.bf16.mxu1 %v3647_v49  ;;  %v161_v49 = vld [vmem:[#allocation6 + $0x2d8] sm:$0xff] }
  0xca   :  { %1420 = vmatpush1.bf16.msra.mxu0 %v3716_v50  ;;  %v165_v50 = vld [vmem:[#allocation6 + $0x2f8] sm:$0xff] }
  0xcb   :  { %1421 = vmatprep.subr.bf16.mxu0 %v3725_v53  ;;  %v3718_v59 = vcombine.low %v161_v49, %v165_v50  ;;  %v197_v16 = vld [vmem:[#allocation6 + $0x3f8] sm:$0xff] }
  0xcc   :  { %1484 = vmatpush1.bf16.msra.mxu1 %v3646_v54  ;;  %v3719_v54 = vcombine.high %v161_v49, %v165_v50  ;;  %v3750_v23 = vcombine.low %v193_v15, %v197_v16  ;;  %v4118_v25 = vld [vmem:[#allocation8 + $0xc] ss:$16 sps:$4 sm:$0xff]   ;;  %v4122_v31 = vld [vmem:[#allocation8 + $0x28] ss:$16 sps:$4 sm:$0xff]   ;;  %v4155_v50 = vld [vmem:[#allocation8 + $0xe0] ss:$16 sps:$4 sm:$0xff]  }
  0xcd   :  { %1485 = vmatprep.subr.bf16.mxu1 %v3655_v56  ;;  %v169_v56 = vld [vmem:[#allocation6 + $0x318] sm:$0xff] }
  0xce   :  { %1422 = vmatpush1.bf16.msra.mxu0 %v3724_v57  ;;  %v173_v57 = vld [vmem:[#allocation6 + $0x338] sm:$0xff] }
  0xcf   :  { %1423 = vmatprep.subr.bf16.mxu0 %v3733_v60  ;;  %v3799_v60 = vcombine.high %v241_v55, %v245_v20  ;;  %v4501_v43 = vld [vmem:[#allocation4 + $0x8] ss:$0 sps:$4 sm:$0xff]  }
  0xd0   :  { %1486 = vmatpush1.bf16.msra.mxu1 %v3654_v47  ;;  %v3727_v47 = vcombine.high %v169_v56, %v173_v57  ;;  %v4130_v33 = vld [vmem:[#allocation8 + $0x4c] ss:$16 sps:$4 sm:$0xff]  }
  0xd1   :  { %1487 = vmatprep.subr.bf16.mxu1 %v3663_v63  ;;  %v177_v63 = vld [vmem:[#allocation6 + $0x358] sm:$0xff] }
  0xd2   :  { %1424 = vmatpush1.bf16.msra.mxu0 %v3732_v0  ;;  %v181_v0 = vld [vmem:[#allocation6 + $0x378] sm:$0xff] }
  0xd3   :  { %1425 = vmatprep.subr.bf16.mxu0 %v3741_v2  ;;  %v3798_v2 = vcombine.low %v241_v55, %v245_v20  ;;  %v3735_v5 = vcombine.high %v177_v63, %v181_v0  ;;  %v4142_v40 = vld [vmem:[#allocation8 + $0x8c] ss:$16 sps:$4 sm:$0xff]   ;;  %v4158_v55 = vld [vmem:[#allocation8 + $0xe8] ss:$16 sps:$4 sm:$0xff]   ;;  %v4169_v20 = vld [vmem:[#allocation8 + $0x124] ss:$16 sps:$4 sm:$0xff]  }
  0xd4   :  { %1488 = vmatpush1.bf16.msra.mxu1 %v3662_v3  ;;  %v3726_v3 = vcombine.low %v169_v56, %v173_v57  ;;  %v4154_v49 = vld [vmem:[#allocation8 + $0xcc] ss:$16 sps:$4 sm:$0xff]   ;;  %v4167_v57 = vld [vmem:[#allocation8 + $0x120] ss:$16 sps:$4 sm:$0xff]  }
  0xd5   :  { %1489 = vmatprep.subr.bf16.mxu1 %v3671_v6  ;;  %v257_v6 = vld [vmem:[#allocation6 + $0x5d8] sm:$0xff] }
  0xd6   :  { %1426 = vmatpush1.bf16.msra.mxu0 %v3740_v9  ;;  %v189_v9 = vld [vmem:[#allocation6 + $0x3b8] sm:$0xff]  ;;  %v3814_v17 = vcombine.low %v257_v6, %v261_v7 }
  0xd7   :  { %1427 = vmatprep.subr.bf16.mxu0 %v3749_v10  ;;  %v3806_v10 = vcombine.low %v249_v61, %v253_v62  ;;  %v3743_v14 = vcombine.high %v185_v8, %v189_v9  ;;  %v4166_v56 = vld [vmem:[#allocation8 + $0x10c] ss:$16 sps:$4 sm:$0xff]   ;;  %v4170_v61 = vld [vmem:[#allocation8 + $0x128] ss:$16 sps:$4 sm:$0xff]   ;;  %v4181_v62 = vld [vmem:[#allocation8 + $0x164] ss:$16 sps:$4 sm:$0xff]  }
  0xd8   :  { %1490 = vmatpush1.bf16.msra.mxu1 %v3670_v11  ;;  %v3734_v11 = vcombine.low %v177_v63, %v181_v0  ;;  %v4178_v63 = vld [vmem:[#allocation8 + $0x14c] ss:$16 sps:$4 sm:$0xff]   ;;  %v4179_v0 = vld [vmem:[#allocation8 + $0x160] ss:$16 sps:$4 sm:$0xff]  }
  0xd9   :  { %1491 = vmatprep.subr.bf16.mxu1 %v3679_v12  ;;  %v3815_v12 = vcombine.high %v257_v6, %v261_v7  ;;  %v4182_v6 = vld [vmem:[#allocation8 + $0x168] ss:$16 sps:$4 sm:$0xff]   ;;  %v4193_v7 = vld [vmem:[#allocation8 + $0x1a4] ss:$16 sps:$4 sm:$0xff]  }
  0xda   :  { %1428 = vmatpush1.bf16.msra.mxu0 %v3748_v18  ;;  %v3742_v18 = vcombine.low %v185_v8, %v189_v9  ;;  %v4190_v8 = vld [vmem:[#allocation8 + $0x18c] ss:$16 sps:$4 sm:$0xff]   ;;  %v4191_v9 = vld [vmem:[#allocation8 + $0x1a0] ss:$16 sps:$4 sm:$0xff]  }
  0xdb   :  { %1520 = vmatprep.subr.bf16.mxu0 %v3759_v21  ;;  %v3751_v21 = vcombine.high %v193_v15, %v197_v16  ;;  %v4194_v15 = vld [vmem:[#allocation8 + $0x1a8] ss:$16 sps:$4 sm:$0xff]   ;;  %v4205_v16 = vld [vmem:[#allocation8 + $0x1e4] ss:$16 sps:$4 sm:$0xff]  }
  0xdc   :  { %1492 = vmatpush1.bf16.msra.mxu1 %v3678_v19  ;;  %v4115_v19 = vld [vmem:[#allocation8 + $0x4] ss:$16 sps:$4 sm:$0xff]  }
  0xdd   :  { %1493 = vmatprep.subr.bf16.mxu1 %v3687_v22  ;;  %1430 = vmatmul.mubr.bf16.vlgmr.msra.gmra.mrb[8].mxu0 %v4673_v13  ;;  %v4113_v22 = vld [vmem:[#allocation8] ss:$16 sps:$4 sm:$0xff]  }
  0xde   :  { %1521 = vmatpush1.bf16.msra.mxu0 %v3758_v26  ;;  %1552 = vmatprep.mubr.bf16.mxu0 %v4579_v1  ;;  %v237_v1 = vld [vmem:[#allocation6 + $0x538] sm:$0xff]  ;;  %v4119_v26 = vld [vmem:[#allocation8 + $0x20] ss:$16 sps:$4 sm:$0xff]  }
  0xdf   :  { %1522 = vmatprep.subr.bf16.mxu0 %v3767_v28  ;;  %v3791_v53 = vcombine.high %v233_v48, %v237_v1  ;;  %v3790_v58 = vcombine.low %v233_v48, %v237_v1  ;;  %v4127_v28 = vld [vmem:[#allocation8 + $0x44] ss:$16 sps:$4 sm:$0xff]   ;;  %v4146_v48 = vld [vmem:[#allocation8 + $0xa8] ss:$16 sps:$4 sm:$0xff]  }
  0xe0   :  { %1494 = vmatpush1.bf16.msra.mxu1 %v3686_v27  ;;  %v4116_v27 = vld [vmem:[#allocation8 + $0x8] ss:$16 sps:$4 sm:$0xff]   ;;  %v4157_v1 = vld [vmem:[#allocation8 + $0xe4] ss:$16 sps:$4 sm:$0xff]  }
  0xe1   :  { %1495 = vmatprep.subr.bf16.mxu1 %v3695_v29  ;;  %v4124_v29 = vld [vmem:[#allocation8 + $0x2c] ss:$16 sps:$4 sm:$0xff]  }
  0xe2   :  { %1523 = vmatpush1.bf16.msra.mxu0 %v3766_v34  ;;  %v4131_v34 = vld [vmem:[#allocation8 + $0x60] ss:$16 sps:$4 sm:$0xff]  }
  0xe3   :  { %1524 = vmatprep.subr.bf16.mxu0 %v3775_v36  ;;  %v4139_v36 = vld [vmem:[#allocation8 + $0x84] ss:$16 sps:$4 sm:$0xff]  }
  0xe4   :  { %1496 = vmatpush1.bf16.msra.mxu1 %v3694_v35  ;;  %v4128_v35 = vld [vmem:[#allocation8 + $0x48] ss:$16 sps:$4 sm:$0xff]  }
  0xe5   :  { %1497 = vmatprep.subr.bf16.mxu1 %v3703_v37  ;;  %v4136_v37 = vld [vmem:[#allocation8 + $0x6c] ss:$16 sps:$4 sm:$0xff]  }
  0xe6   :  { %1525 = vmatpush1.bf16.msra.mxu0 %v3774_v42  ;;  %v4140_v42 = vld [vmem:[#allocation8 + $0x88] ss:$16 sps:$4 sm:$0xff]  }
  0xe7   :  { %1526 = vmatprep.subr.bf16.mxu0 %v3783_v45  ;;  %v4148_v45 = vld [vmem:[#allocation8 + $0xac] ss:$16 sps:$4 sm:$0xff]  }
  0xe8   :  { %1498 = vmatpush1.bf16.msra.mxu1 %v3702_v44  ;;  %v4151_v44 = vld [vmem:[#allocation8 + $0xc4] ss:$16 sps:$4 sm:$0xff]  }
  0xe9   :  { %1499 = vmatprep.subr.bf16.mxu1 %v3711_v46  ;;  %v4149_v46 = vld [vmem:[#allocation8 + $0xc0] ss:$16 sps:$4 sm:$0xff]  }
  0xea   :  { %1527 = vmatpush1.bf16.msra.mxu0 %v3782_v51  ;;  %v4152_v51 = vld [vmem:[#allocation8 + $0xc8] ss:$16 sps:$4 sm:$0xff]  }
  0xeb   :  { %1528 = vmatprep.subr.bf16.mxu0 %v3791_v53  ;;  %v4160_v53 = vld [vmem:[#allocation8 + $0xec] ss:$16 sps:$4 sm:$0xff]  }
  0xec   :  { %1500 = vmatpush1.bf16.msra.mxu1 %v3710_v52  ;;  %v4163_v52 = vld [vmem:[#allocation8 + $0x104] ss:$16 sps:$4 sm:$0xff]  }
  0xed   :  { %1501 = vmatprep.subr.bf16.mxu1 %v3719_v54  ;;  %v4161_v54 = vld [vmem:[#allocation8 + $0x100] ss:$16 sps:$4 sm:$0xff]  }
  0xee   :  { %1529 = vmatpush1.bf16.msra.mxu0 %v3790_v58  ;;  %v4164_v58 = vld [vmem:[#allocation8 + $0x108] ss:$16 sps:$4 sm:$0xff]  }
  0xef   :  { %1530 = vmatprep.subr.bf16.mxu0 %v3799_v60  ;;  %v4172_v60 = vld [vmem:[#allocation8 + $0x12c] ss:$16 sps:$4 sm:$0xff]  }
  0xf0   :  { %1502 = vmatpush1.bf16.msra.mxu1 %v3718_v59  ;;  %v4175_v59 = vld [vmem:[#allocation8 + $0x144] ss:$16 sps:$4 sm:$0xff]  }
  0xf1   :  { %1503 = vmatprep.subr.bf16.mxu1 %v3727_v47  ;;  %v4173_v47 = vld [vmem:[#allocation8 + $0x140] ss:$16 sps:$4 sm:$0xff]  }
  0xf2   :  { %1531 = vmatpush1.bf16.msra.mxu0 %v3798_v2  ;;  %v4176_v2 = vld [vmem:[#allocation8 + $0x148] ss:$16 sps:$4 sm:$0xff]  }
  0xf3   :  { %1532 = vmatprep.subr.bf16.mxu0 %v3807_v4  ;;  %v4184_v4 = vld [vmem:[#allocation8 + $0x16c] ss:$16 sps:$4 sm:$0xff]  }
  0xf4   :  { %1504 = vmatpush1.bf16.msra.mxu1 %v3726_v3  ;;  %v4187_v3 = vld [vmem:[#allocation8 + $0x184] ss:$16 sps:$4 sm:$0xff]  }
  0xf5   :  { %1505 = vmatprep.subr.bf16.mxu1 %v3735_v5  ;;  %v4185_v5 = vld [vmem:[#allocation8 + $0x180] ss:$16 sps:$4 sm:$0xff]  }
  0xf6   :  { %1533 = vmatpush1.bf16.msra.mxu0 %v3806_v10  ;;  %v4188_v10 = vld [vmem:[#allocation8 + $0x188] ss:$16 sps:$4 sm:$0xff]  }
  0xf7   :  { %1534 = vmatprep.subr.bf16.mxu0 %v3815_v12  ;;  %v4196_v12 = vld [vmem:[#allocation8 + $0x1ac] ss:$16 sps:$4 sm:$0xff]  }
  0xf8   :  { %1506 = vmatpush1.bf16.msra.mxu1 %v3734_v11  ;;  %v4199_v11 = vld [vmem:[#allocation8 + $0x1c4] ss:$16 sps:$4 sm:$0xff]  }
  0xf9   :  { %1507 = vmatprep.subr.bf16.mxu1 %v3743_v14  ;;  %v4197_v14 = vld [vmem:[#allocation8 + $0x1c0] ss:$16 sps:$4 sm:$0xff]  }
  0xfa   :  { %1535 = vmatpush1.bf16.msra.mxu0 %v3814_v17  ;;  %v4202_v17 = vld [vmem:[#allocation8 + $0x1cc] ss:$16 sps:$4 sm:$0xff]  }
  0xfb   :  { %3236 = vmatprep.subr.bf16.mxu0 %v4115_v19 }
  0xfc   :  { %1508 = vmatpush1.bf16.msra.mxu1 %v3742_v18 }
  0xfd   :  { %1509 = vmatprep.subr.bf16.mxu1 %v3751_v21  ;;  %1553 = vmatmul.mubr.bf16.vlgmr.msra.gmra.mrb[12].mxu0 %v4501_v43  ;;  %v4203_v21 = vld [vmem:[#allocation8 + $0x1e0] ss:$16 sps:$4 sm:$0xff]   ;;  %v4208_v43 = vld [vmem:[#allocation8 + $0x1ec] ss:$16 sps:$4 sm:$0xff]  }
  0xfe   :  { %3237 = vmatpush1.bf16.msra.mxu0 %v4113_v22 }
  0xff   :  { %3238 = vmatprep.subr.bf16.mxu0 %v4121_v24  ;;  %v4211_v24 = vld [vmem:[#allocation8 + $0x204] ss:$16 sps:$4 sm:$0xff]  }
 0x100   :  { %1510 = vmatpush1.bf16.msra.mxu1 %v3750_v23  ;;  %v4200_v23 = vld [vmem:[#allocation8 + $0x1c8] ss:$16 sps:$4 sm:$0xff]  }
 0x101   :  { %3400 = vmatprep.subr.bf16.mxu1 %v4118_v25 }
 0x102   :  { %3239 = vmatpush1.bf16.msra.mxu0 %v4119_v26  ;;  %v4206_v26 = vld [vmem:[#allocation8 + $0x1e8] ss:$16 sps:$4 sm:$0xff]  }
 0x103   :  { %1512 = vmatmul.mubr.bf16.vlgmr.msra.gmra.mrb[12].mxu1 %v4673_v13  ;;  %3240 = vmatprep.subr.bf16.mxu0 %v4127_v28  ;;  %v4134_v13 = vld [vmem:[#allocation8 + $0x68] ss:$16 sps:$4 sm:$0xff]   ;;  %v1614_v28 = vlaneseq }
 0x104   :  { %3401 = vmatpush1.bf16.msra.mxu1 %v4116_v27  ;;  %v4214_v27 = vld [vmem:[#allocation8 + $0x20c] ss:$16 sps:$4 sm:$0xff]  }
 0x105   :  { %3402 = vmatprep.subr.bf16.mxu1 %v4124_v29  ;;  %v4686_v29 = vshrl.u32 %v1614_v28, 7 }
 0x106   :  { %3241 = vmatpush1.bf16.msra.mxu0 %v4125_v30 }
 0x107   :  { %3242 = vmatprep.subr.bf16.mxu0 %v4133_v32  ;;  %v4689_v30 = vsub.s32 0, %v4686_v29  ;;  %v4697_v32 = vsub.s32 1, %v4686_v29 }
 0x108   :  { %3403 = vmatpush1.bf16.msra.mxu1 %v4122_v31  ;;  %v4694_v31 = vld [vmem:[%s4752_s2] sm:$0xff] }
 0x109   :  { %3404 = vmatprep.subr.bf16.mxu1 %v4130_v33  ;;  %v1617_v33 = vrot.slane %v4694_v31, %v4689_v30 }
 0x10a   :  { %3243 = vmatpush1.bf16.msra.mxu0 %v4131_v34 }
 0x10b   :  { %3244 = vmatprep.subr.bf16.mxu0 %v4139_v36 }
 0x10c   :  { %3405 = vmatpush1.bf16.msra.mxu1 %v4128_v35  ;;  %v1621_v35 = vrot.slane %v4694_v31, %v4697_v32 }
 0x10d   :  { %3406 = vmatprep.subr.bf16.mxu1 %v4136_v37 }
 0x10e   :  { %3245 = vmatpush1.bf16.msra.mxu0 %v4137_v38 }
 0x10f   :  { %3246 = vmatprep.subr.bf16.mxu0 %v4145_v39 }
 0x110   :  { %3407 = vmatpush1.bf16.msra.mxu1 %v4134_v13 }
 0x111   :  { %3408 = vmatprep.subr.bf16.mxu1 %v4142_v40 }
 0x112   :  { %3247 = vmatpush1.bf16.msra.mxu0 %v4143_v41 }
 0x113   :  { %3248 = vmatprep.subr.bf16.mxu0 %v4151_v44 }
 0x114   :  { %3409 = vmatpush1.bf16.msra.mxu1 %v4140_v42 }
 0x115   :  { %3410 = vmatprep.subr.bf16.mxu1 %v4148_v45 }
 0x116   :  { %3249 = vmatpush1.bf16.msra.mxu0 %v4149_v46  ;;  %v4209_v46 = vld [vmem:[#allocation8 + $0x200] ss:$16 sps:$4 sm:$0xff]  }
 0x117   :  { %3250 = vmatprep.subr.bf16.mxu0 %v4157_v1 }
 0x118   :  { %3411 = vmatpush1.bf16.msra.mxu1 %v4146_v48  ;;  %v4212_v48 = vld [vmem:[#allocation8 + $0x208] ss:$16 sps:$4 sm:$0xff]  }
 0x119   :  { %3412 = vmatprep.subr.bf16.mxu1 %v4154_v49  ;;  %v4217_v49 = vld [vmem:[#allocation8 + $0x224] ss:$16 sps:$4 sm:$0xff]  }
 0x11a   :  { %3251 = vmatpush1.bf16.msra.mxu0 %v4155_v50  ;;  %v4220_v50 = vld [vmem:[#allocation8 + $0x22c] ss:$16 sps:$4 sm:$0xff]  }
 0x11b   :  { %3252 = vmatprep.subr.bf16.mxu0 %v4163_v52  ;;  %v4218_v52 = vld [vmem:[#allocation8 + $0x228] ss:$16 sps:$4 sm:$0xff]  }
 0x11c   :  { %3413 = vmatpush1.bf16.msra.mxu1 %v4152_v51  ;;  %v4215_v51 = vld [vmem:[#allocation8 + $0x220] ss:$16 sps:$4 sm:$0xff]  }
 0x11d   :  { %3414 = vmatprep.subr.bf16.mxu1 %v4160_v53  ;;  %v4223_v53 = vld [vmem:[#allocation8 + $0x244] ss:$16 sps:$4 sm:$0xff]  }
 0x11e   :  { %3253 = vmatpush1.bf16.msra.mxu0 %v4161_v54  ;;  %v4226_v54 = vld [vmem:[#allocation8 + $0x24c] ss:$16 sps:$4 sm:$0xff]  }
 0x11f   :  { %3254 = vmatprep.subr.bf16.mxu0 %v4169_v20  ;;  %v4224_v20 = vld [vmem:[#allocation8 + $0x248] ss:$16 sps:$4 sm:$0xff]  }
 0x120   :  { %3415 = vmatpush1.bf16.msra.mxu1 %v4158_v55  ;;  %v4221_v55 = vld [vmem:[#allocation8 + $0x240] ss:$16 sps:$4 sm:$0xff]  }
 0x121   :  { %3416 = vmatprep.subr.bf16.mxu1 %v4166_v56  ;;  %v4229_v56 = vld [vmem:[#allocation8 + $0x264] ss:$16 sps:$4 sm:$0xff]  }
 0x122   :  { %3255 = vmatpush1.bf16.msra.mxu0 %v4167_v57  ;;  %v4232_v57 = vld [vmem:[#allocation8 + $0x26c] ss:$16 sps:$4 sm:$0xff]  }
 0x123   :  { %3256 = vmatprep.subr.bf16.mxu0 %v4175_v59  ;;  %v4230_v59 = vld [vmem:[#allocation8 + $0x268] ss:$16 sps:$4 sm:$0xff]  }
 0x124   :  { %3417 = vmatpush1.bf16.msra.mxu1 %v4164_v58  ;;  %v4227_v58 = vld [vmem:[#allocation8 + $0x260] ss:$16 sps:$4 sm:$0xff]  }
 0x125   :  { %3418 = vmatprep.subr.bf16.mxu1 %v4172_v60  ;;  %v4235_v60 = vld [vmem:[#allocation8 + $0x284] ss:$16 sps:$4 sm:$0xff]  }
 0x126   :  { %3257 = vmatpush1.bf16.msra.mxu0 %v4173_v47  ;;  %v4238_v47 = vld [vmem:[#allocation8 + $0x28c] ss:$16 sps:$4 sm:$0xff]  }
 0x127   :  { %3258 = vmatprep.subr.bf16.mxu0 %v4181_v62  ;;  %v4236_v62 = vld [vmem:[#allocation8 + $0x288] ss:$16 sps:$4 sm:$0xff]  }
 0x128   :  { %3419 = vmatpush1.bf16.msra.mxu1 %v4170_v61  ;;  %v4233_v61 = vld [vmem:[#allocation8 + $0x280] ss:$16 sps:$4 sm:$0xff]  }
 0x129   :  { %3420 = vmatprep.subr.bf16.mxu1 %v4178_v63  ;;  %v4241_v63 = vld [vmem:[#allocation8 + $0x2a4] ss:$16 sps:$4 sm:$0xff]  }
 0x12a   :  { %3259 = vmatpush1.bf16.msra.mxu0 %v4179_v0  ;;  %v4244_v0 = vld [vmem:[#allocation8 + $0x2ac] ss:$16 sps:$4 sm:$0xff]  }
 0x12b   :  { %3260 = vmatprep.subr.bf16.mxu0 %v4187_v3  ;;  %v4242_v3 = vld [vmem:[#allocation8 + $0x2a8] ss:$16 sps:$4 sm:$0xff]  }
 0x12c   :  { %3421 = vmatpush1.bf16.msra.mxu1 %v4176_v2  ;;  %v4239_v2 = vld [vmem:[#allocation8 + $0x2a0] ss:$16 sps:$4 sm:$0xff]  }
 0x12d   :  { %3422 = vmatprep.subr.bf16.mxu1 %v4184_v4  ;;  %v4247_v4 = vld [vmem:[#allocation8 + $0x2c4] ss:$16 sps:$4 sm:$0xff]  }
 0x12e   :  { %3261 = vmatpush1.bf16.msra.mxu0 %v4185_v5  ;;  %v4250_v5 = vld [vmem:[#allocation8 + $0x2cc] ss:$16 sps:$4 sm:$0xff]  }
 0x12f   :  { %3262 = vmatprep.subr.bf16.mxu0 %v4193_v7  ;;  %v4248_v7 = vld [vmem:[#allocation8 + $0x2c8] ss:$16 sps:$4 sm:$0xff]  }
 0x130   :  { %3423 = vmatpush1.bf16.msra.mxu1 %v4182_v6  ;;  %v4245_v6 = vld [vmem:[#allocation8 + $0x2c0] ss:$16 sps:$4 sm:$0xff]  }
 0x131   :  { %3424 = vmatprep.subr.bf16.mxu1 %v4190_v8 }
 0x132   :  { %3263 = vmatpush1.bf16.msra.mxu0 %v4191_v9  ;;  %v4253_v9 = vld [vmem:[#allocation8 + $0x2e4] ss:$16 sps:$4 sm:$0xff]  }
 0x133   :  { %3264 = vmatprep.subr.bf16.mxu0 %v4199_v11 }
 0x134   :  { %3425 = vmatpush1.bf16.msra.mxu1 %v4188_v10  ;;  %v4256_v10 = vld [vmem:[#allocation8 + $0x2ec] ss:$16 sps:$4 sm:$0xff]  }
 0x135   :  { %3426 = vmatprep.subr.bf16.mxu1 %v4196_v12  ;;  %v4704_v12 = vsub.s32 3, %v4686_v29 }
 0x136   :  { %v1308_v18 = vpop.f32.mrb[0].mxu1  ;;  %3265 = vmatpush1.bf16.msra.mxu0 %v4197_v14 }
 0x137   :  { %v1310_v19 = vpop.f32.mrb[1].mxu1  ;;  %3266 = vmatprep.subr.bf16.mxu0 %v4205_v16  ;;  %v4251_v16 = vld [vmem:[#allocation8 + $0x2e0] ss:$16 sps:$4 sm:$0xff]  }
 0x138   :  { %v1312_v22 = vpop.f32.mrb[2].mxu1  ;;  %3427 = vmatpush1.bf16.msra.mxu1 %v4194_v15 }
 0x139   :  { %v1313_v25 = vpop.f32.mrb[3].mxu1  ;;  %3428 = vmatprep.subr.bf16.mxu1 %v4202_v17  ;;  %v4254_v17 = vld [vmem:[#allocation8 + $0x2e8] ss:$16 sps:$4 sm:$0xff]   ;;  %v1629_v22 = vrot.slane %v4694_v31, %v4704_v12 }
 0x13a   :  { %3267 = vmatpush1.bf16.msra.mxu0 %v4203_v21 }
 0x13b   :  { %3277 = vmatprep.subr.bf16.mxu0 %v4211_v24 }
 0x13c   :  { %3429 = vmatpush1.bf16.msra.mxu1 %v4200_v23 }
 0x13d   :  { %3430 = vmatprep.subr.bf16.mxu1 %v4208_v43 }
 0x140   :  { %3431 = vmatpush1.bf16.msra.mxu1 %v4206_v26  ;;  %v4257_v26 = vld [vmem:[#allocation8 + $0x300] ss:$16 sps:$4 sm:$0xff]  }
 0x141   :  { %3441 = vmatprep.subr.bf16.mxu1 %v4214_v27  ;;  %v4260_v27 = vld [vmem:[#allocation8 + $0x308] ss:$16 sps:$4 sm:$0xff]  }
 0x150   :  { %v1267_v34 = vpop.f32.mrb[0].mxu0 }
 0x151   :  { %v1309_v36 = vadd.f32 %v1308_v18, %v1267_v34  ;;  %v1269_v37 = vpop.f32.mrb[1].mxu0  ;;  %v4259_v18 = vld [vmem:[#allocation8 + $0x304] ss:$16 sps:$4 sm:$0xff]   ;;  %v4268_v34 = vld [vmem:[#allocation8 + $0x32c] ss:$16 sps:$4 sm:$0xff]  }
 0x152   :  { %v1311_v38 = vadd.f32 %v1310_v19, %v1269_v37  ;;  %v1271_v13 = vpop.f32.mrb[2].mxu0  ;;  %v4262_v19 = vld [vmem:[#allocation8 + $0x30c] ss:$16 sps:$4 sm:$0xff]   ;;  %v4263_v37 = vld [vmem:[#allocation8 + $0x320] ss:$16 sps:$4 sm:$0xff]  }
 0x153   :  { %v1654_v39 = vadd.f32 %v1617_v33, %v1309_v36  ;;  %v1272_v40 = vpop.f32.mrb[3].mxu0  ;;  %v4265_v33 = vld [vmem:[#allocation8 + $0x324] ss:$16 sps:$4 sm:$0xff]  }
 0x154   :  { %v1655_v41 = vadd.f32 %v1621_v35, %v1311_v38  ;;  %v4266_v38 = vld [vmem:[#allocation8 + $0x328] ss:$16 sps:$4 sm:$0xff]   ;;  %v4271_v13 = vld [vmem:[#allocation8 + $0x344] ss:$16 sps:$4 sm:$0xff]  }
 0x155   :  { %v1662_v42 = vmax.f32 %v1654_v39, 0.0  ;;  %v4274_v39 = vld [vmem:[#allocation8 + $0x34c] ss:$16 sps:$4 sm:$0xff]  }
 0x156   :  { %v1663_v44 = vmax.f32 %v1655_v41, 0.0  ;;  %v4269_v41 = vld [vmem:[#allocation8 + $0x340] ss:$16 sps:$4 sm:$0xff]  }
 0x157   :  { %v1670_v1 = vpack.c.bf16 %v1662_v42, %v1662_v42  ;;  %v4272_v42 = vld [vmem:[#allocation8 + $0x348] ss:$16 sps:$4 sm:$0xff]  }
 0x158   :  { %v1671_v45 = vpack.c.bf16 %v1663_v44, %v1663_v44  ;;  %v4277_v44 = vld [vmem:[#allocation8 + $0x364] ss:$16 sps:$4 sm:$0xff]  }
 0x15a   :  { %3268 = vmatprep.mubr.bf16.mxu0 %v1671_v45  ;;  %3432 = vmatprep.mubr.bf16.mxu1 %v1671_v45  ;;  %v4280_v45 = vld [vmem:[#allocation8 + $0x36c] ss:$16 sps:$4 sm:$0xff]  }
 0x15b   :  { %3269 = vmatmul.mubr.bf16.vlgmr.msra.gmra.mrb[16].mxu0 %v1670_v1  ;;  %3433 = vmatmul.mubr.bf16.vlgmr.msra.gmra.mrb[16].mxu1 %v1670_v1  ;;  %v4283_v1 = vld [vmem:[#allocation8 + $0x384] ss:$16 sps:$4 sm:$0xff]  }
 0x15c   :  { %3278 = vmatpush1.bf16.msra.mxu0 %v4209_v46  ;;  %3442 = vmatpush1.bf16.msra.mxu1 %v4212_v48  ;;  %v4275_v46 = vld [vmem:[#allocation8 + $0x360] ss:$16 sps:$4 sm:$0xff]   ;;  %v4278_v48 = vld [vmem:[#allocation8 + $0x368] ss:$16 sps:$4 sm:$0xff]  }
 0x15d   :  { %3279 = vmatprep.subr.bf16.mxu0 %v4217_v49  ;;  %3443 = vmatprep.subr.bf16.mxu1 %v4220_v50  ;;  %v4286_v49 = vld [vmem:[#allocation8 + $0x38c] ss:$16 sps:$4 sm:$0xff]   ;;  %v4281_v50 = vld [vmem:[#allocation8 + $0x380] ss:$16 sps:$4 sm:$0xff]  }
 0x160   :  { %3280 = vmatpush1.bf16.msra.mxu0 %v4215_v51  ;;  %3444 = vmatpush1.bf16.msra.mxu1 %v4218_v52  ;;  %v4284_v51 = vld [vmem:[#allocation8 + $0x388] ss:$16 sps:$4 sm:$0xff]   ;;  %v4711_v52 = vsub.s32 2, %v4686_v29 }
 0x161   :  { %3281 = vmatprep.subr.bf16.mxu0 %v4223_v53  ;;  %3445 = vmatprep.subr.bf16.mxu1 %v4226_v54  ;;  %v4289_v53 = vld [vmem:[#allocation8 + $0x3a4] ss:$16 sps:$4 sm:$0xff]   ;;  %v4292_v54 = vld [vmem:[#allocation8 + $0x3ac] ss:$16 sps:$4 sm:$0xff]  }
 0x164   :  { %3282 = vmatpush1.bf16.msra.mxu0 %v4221_v55  ;;  %3446 = vmatpush1.bf16.msra.mxu1 %v4224_v20  ;;  %v4287_v55 = vld [vmem:[#allocation8 + $0x3a0] ss:$16 sps:$4 sm:$0xff]   ;;  %v4290_v20 = vld [vmem:[#allocation8 + $0x3a8] ss:$16 sps:$4 sm:$0xff]  }
 0x165   :  { %3283 = vmatprep.subr.bf16.mxu0 %v4229_v56  ;;  %3447 = vmatprep.subr.bf16.mxu1 %v4232_v57  ;;  %v1625_v56 = vrot.slane %v4694_v31, %v4711_v52  ;;  %v4295_v57 = vld [vmem:[#allocation8 + $0x3c4] ss:$16 sps:$4 sm:$0xff]  }
 0x168   :  { %3284 = vmatpush1.bf16.msra.mxu0 %v4227_v58  ;;  %3448 = vmatpush1.bf16.msra.mxu1 %v4230_v59  ;;  %v4298_v58 = vld [vmem:[#allocation8 + $0x3cc] ss:$16 sps:$4 sm:$0xff]   ;;  %v4293_v59 = vld [vmem:[#allocation8 + $0x3c0] ss:$16 sps:$4 sm:$0xff]  }
 0x169   :  { %3285 = vmatprep.subr.bf16.mxu0 %v4235_v60  ;;  %3449 = vmatprep.subr.bf16.mxu1 %v4238_v47  ;;  %v4296_v60 = vld [vmem:[#allocation8 + $0x3c8] ss:$16 sps:$4 sm:$0xff]  }
 0x16c   :  { %3286 = vmatpush1.bf16.msra.mxu0 %v4233_v61  ;;  %3450 = vmatpush1.bf16.msra.mxu1 %v4236_v62  ;;  %v4301_v61 = vld [vmem:[#allocation8 + $0x3e4] ss:$16 sps:$4 sm:$0xff]   ;;  %v4304_v62 = vld [vmem:[#allocation8 + $0x3ec] ss:$16 sps:$4 sm:$0xff]  }
 0x16d   :  { %3287 = vmatprep.subr.bf16.mxu0 %v4241_v63  ;;  %3451 = vmatprep.subr.bf16.mxu1 %v4244_v0  ;;  %v4299_v63 = vld [vmem:[#allocation8 + $0x3e0] ss:$16 sps:$4 sm:$0xff]   ;;  %v4302_v0 = vld [vmem:[#allocation8 + $0x3e8] ss:$16 sps:$4 sm:$0xff]  }
 0x170   :  { %3288 = vmatpush1.bf16.msra.mxu0 %v4239_v2  ;;  %3452 = vmatpush1.bf16.msra.mxu1 %v4242_v3  ;;  %v1390_v8 = vpop.f32.mrb[4].mxu0  ;;  %v4307_v3 = vld [vmem:[#allocation8 + $0x404] ss:$16 sps:$4 sm:$0xff]  }
 0x171   :  { %3289 = vmatprep.subr.bf16.mxu0 %v4247_v4  ;;  %3453 = vmatprep.subr.bf16.mxu1 %v4250_v5  ;;  %v1392_v11 = vpop.f32.mrb[5].mxu0  ;;  %v4310_v4 = vld [vmem:[#allocation8 + $0x40c] ss:$16 sps:$4 sm:$0xff]  }
 0x172   :  { %v1394_v14 = vpop.f32.mrb[6].mxu0 }
 0x173   :  { %v1395_v15 = vpop.f32.mrb[7].mxu0  ;;  %v4313_v14 = vld [vmem:[#allocation8 + $0x424] ss:$16 sps:$4 sm:$0xff]  }
 0x174   :  { %3290 = vmatpush1.bf16.msra.mxu0 %v4245_v6  ;;  %3454 = vmatpush1.bf16.msra.mxu1 %v4248_v7  ;;  %v4316_v15 = vld [vmem:[#allocation8 + $0x42c] ss:$16 sps:$4 sm:$0xff]  }
 0x175   :  { %3291 = vmatprep.subr.bf16.mxu0 %v4253_v9  ;;  %3455 = vmatprep.subr.bf16.mxu1 %v4256_v10  ;;  %v4308_v9 = vld [vmem:[#allocation8 + $0x408] ss:$16 sps:$4 sm:$0xff]  }
 0x176   :  { %v1349_v21 = vpop.f32.mrb[4].mxu1 }
 0x177   :  { %v4708_v23 = vadd.f32 %v1390_v8, %v1349_v21  ;;  %v1351_v24 = vpop.f32.mrb[5].mxu1  ;;  %v4305_v8 = vld [vmem:[#allocation8 + $0x400] ss:$16 sps:$4 sm:$0xff]  }
 0x178   :  { %v1393_v25 = vadd.f32 %v1392_v11, %v1351_v24  ;;  %v1353_v43 = vpop.f32.mrb[6].mxu1  ;;  %3292 = vmatpush1.bf16.msra.mxu0 %v4251_v16  ;;  %3456 = vmatpush1.bf16.msra.mxu1 %v4254_v17  ;;  %v4311_v16 = vld [vmem:[#allocation8 + $0x420] ss:$16 sps:$4 sm:$0xff]   ;;  %v4314_v17 = vld [vmem:[#allocation8 + $0x428] ss:$16 sps:$4 sm:$0xff]  }
 0x179   :  { %v1354_v28 = vpop.f32.mrb[7].mxu1  ;;  %3293 = vmatprep.subr.bf16.mxu0 %v4259_v18  ;;  %3457 = vmatprep.subr.bf16.mxu1 %v4262_v19  ;;  %v1656_v47 = vadd.f32 %v1625_v56, %v4708_v23  ;;  %v4319_v18 = vld [vmem:[#allocation8 + $0x444] ss:$16 sps:$4 sm:$0xff]   ;;  %v4322_v19 = vld [vmem:[#allocation8 + $0x44c] ss:$16 sps:$4 sm:$0xff]  }
 0x17a   :  { %v1657_v35 = vadd.f32 %v1629_v22, %v1393_v25  ;;  %v4317_v21 = vld [vmem:[#allocation8 + $0x440] ss:$16 sps:$4 sm:$0xff]   ;;  %v4320_v22 = vld [vmem:[#allocation8 + $0x448] ss:$16 sps:$4 sm:$0xff]   ;;  %v4325_v23 = vld [vmem:[#allocation8 + $0x464] ss:$16 sps:$4 sm:$0xff]  }
 0x17b   :  { %v1664_v2 = vmax.f32 %v1656_v47, 0.0  ;;  %v4328_v24 = vld [vmem:[#allocation8 + $0x46c] ss:$16 sps:$4 sm:$0xff]   ;;  %v4323_v25 = vld [vmem:[#allocation8 + $0x460] ss:$16 sps:$4 sm:$0xff]  }
 0x17c   :  { %v1665_v36 = vmax.f32 %v1657_v35, 0.0  ;;  %3294 = vmatpush1.bf16.msra.mxu0 %v4257_v26  ;;  %3458 = vmatpush1.bf16.msra.mxu1 %v4260_v27  ;;  %v4326_v43 = vld [vmem:[#allocation8 + $0x468] ss:$16 sps:$4 sm:$0xff]   ;;  %v4331_v26 = vld [vmem:[#allocation8 + $0x484] ss:$16 sps:$4 sm:$0xff]  }
 0x17d   :  { %3295 = vmatprep.subr.bf16.mxu0 %v4265_v33  ;;  %3459 = vmatprep.subr.bf16.mxu1 %v4268_v34  ;;  %v1672_v11 = vpack.c.bf16 %v1664_v2, %v1664_v2  ;;  %v4334_v27 = vld [vmem:[#allocation8 + $0x48c] ss:$16 sps:$4 sm:$0xff]   ;;  %v4329_v28 = vld [vmem:[#allocation8 + $0x480] ss:$16 sps:$4 sm:$0xff]   ;;  %v4332_v33 = vld [vmem:[#allocation8 + $0x488] ss:$16 sps:$4 sm:$0xff]  }
 0x17e   :  { %v1673_v40 = vpack.c.bf16 %v1665_v36, %v1665_v36  ;;  %v4337_v34 = vld [vmem:[#allocation8 + $0x4a4] ss:$16 sps:$4 sm:$0xff]   ;;  %v4340_v35 = vld [vmem:[#allocation8 + $0x4ac] ss:$16 sps:$4 sm:$0xff]   ;;  %v4335_v36 = vld [vmem:[#allocation8 + $0x4a0] ss:$16 sps:$4 sm:$0xff]  }
 0x17f   :  { %v4358_v56 = vld [vmem:[#allocation8 + $0x50c] ss:$16 sps:$4 sm:$0xff]   ;;  %v4361_v47 = vld [vmem:[#allocation8 + $0x524] ss:$16 sps:$4 sm:$0xff]  }
 0x180   :  { %3309 = vmatprep.mubr.bf16.mxu0 %v1673_v40  ;;  %3473 = vmatprep.mubr.bf16.mxu1 %v1673_v40  ;;  %v4370_v2 = vld [vmem:[#allocation8 + $0x54c] ss:$16 sps:$4 sm:$0xff]  }
 0x181   :  { %3296 = vmatpush1.bf16.msra.mxu0 %v4263_v37  ;;  %3460 = vmatpush1.bf16.msra.mxu1 %v4266_v38  ;;  %v4338_v37 = vld [vmem:[#allocation8 + $0x4a8] ss:$16 sps:$4 sm:$0xff]   ;;  %v1636_v38 = vsub.s32 5, %v4686_v29 }
 0x182   :  { %3297 = vmatprep.subr.bf16.mxu0 %v4271_v13  ;;  %3461 = vmatprep.subr.bf16.mxu1 %v4274_v39  ;;  %v4343_v13 = vld [vmem:[#allocation8 + $0x4c4] ss:$16 sps:$4 sm:$0xff]   ;;  %v4346_v39 = vld [vmem:[#allocation8 + $0x4cc] ss:$16 sps:$4 sm:$0xff]  }
 0x185   :  { %3298 = vmatpush1.bf16.msra.mxu0 %v4269_v41  ;;  %3462 = vmatpush1.bf16.msra.mxu1 %v4272_v42  ;;  %v1637_v41 = vrot.slane %v4694_v31, %v1636_v38  ;;  %v4341_v42 = vld [vmem:[#allocation8 + $0x4c0] ss:$16 sps:$4 sm:$0xff]   ;;  %v4398_v38 = vld [vmem:[#allocation8 + $0x5e8] ss:$16 sps:$4 sm:$0xff]  }
 0x186   :  { %3299 = vmatprep.subr.bf16.mxu0 %v4277_v44  ;;  %3463 = vmatprep.subr.bf16.mxu1 %v4280_v45  ;;  %v4344_v44 = vld [vmem:[#allocation8 + $0x4c8] ss:$16 sps:$4 sm:$0xff]  }
 0x189   :  { %3300 = vmatpush1.bf16.msra.mxu0 %v4275_v46  ;;  %3464 = vmatpush1.bf16.msra.mxu1 %v4278_v48  ;;  %v4349_v48 = vld [vmem:[#allocation8 + $0x4e4] ss:$16 sps:$4 sm:$0xff]  }
 0x18a   :  { %3301 = vmatprep.subr.bf16.mxu0 %v4283_v1  ;;  %3465 = vmatprep.subr.bf16.mxu1 %v4286_v49  ;;  %v4352_v1 = vld [vmem:[#allocation8 + $0x4ec] ss:$16 sps:$4 sm:$0xff]  }
 0x18d   :  { %3302 = vmatpush1.bf16.msra.mxu0 %v4281_v50  ;;  %3466 = vmatpush1.bf16.msra.mxu1 %v4284_v51 }
 0x18e   :  { %3303 = vmatprep.subr.bf16.mxu0 %v4289_v53  ;;  %3467 = vmatprep.subr.bf16.mxu1 %v4292_v54  ;;  %v4347_v54 = vld [vmem:[#allocation8 + $0x4e0] ss:$16 sps:$4 sm:$0xff]  }
 0x191   :  { %3304 = vmatpush1.bf16.msra.mxu0 %v4287_v55  ;;  %3468 = vmatpush1.bf16.msra.mxu1 %v4290_v20  ;;  %v4350_v55 = vld [vmem:[#allocation8 + $0x4e8] ss:$16 sps:$4 sm:$0xff]   ;;  %v4355_v20 = vld [vmem:[#allocation8 + $0x504] ss:$16 sps:$4 sm:$0xff]  }
 0x192   :  { %3305 = vmatprep.subr.bf16.mxu0 %v4295_v57  ;;  %3469 = vmatprep.subr.bf16.mxu1 %v4298_v58 }
 0x195   :  { %3306 = vmatpush1.bf16.msra.mxu0 %v4293_v59  ;;  %3470 = vmatpush1.bf16.msra.mxu1 %v4296_v60  ;;  %v4353_v59 = vld [vmem:[#allocation8 + $0x500] ss:$16 sps:$4 sm:$0xff]   ;;  %v4356_v60 = vld [vmem:[#allocation8 + $0x508] ss:$16 sps:$4 sm:$0xff]  }
 0x196   :  { %3307 = vmatprep.subr.bf16.mxu0 %v4301_v61  ;;  %3471 = vmatprep.subr.bf16.mxu1 %v4304_v62  ;;  %v1472_v5 = vpop.f32.mrb[8].mxu1  ;;  %v4364_v61 = vld [vmem:[#allocation8 + $0x52c] ss:$16 sps:$4 sm:$0xff]   ;;  %v4359_v62 = vld [vmem:[#allocation8 + $0x520] ss:$16 sps:$4 sm:$0xff]  }
 0x197   :  { %v4716_v6 = vpop.f32.mrb[9].mxu1 }
 0x198   :  { %v1476_v7 = vpop.f32.mrb[10].mxu1 }
 0x199   :  { %3308 = vmatpush1.bf16.msra.mxu0 %v4299_v63  ;;  %3472 = vmatpush1.bf16.msra.mxu1 %v4302_v0  ;;  %v1477_v10 = vpop.f32.mrb[11].mxu1  ;;  %v4362_v63 = vld [vmem:[#allocation8 + $0x528] ss:$16 sps:$4 sm:$0xff]   ;;  %v4367_v0 = vld [vmem:[#allocation8 + $0x544] ss:$16 sps:$4 sm:$0xff]  }
 0x19a   :  { %3318 = vmatprep.subr.bf16.mxu0 %v4307_v3  ;;  %3482 = vmatprep.subr.bf16.mxu1 %v4310_v4  ;;  %v4365_v3 = vld [vmem:[#allocation8 + $0x540] ss:$16 sps:$4 sm:$0xff]   ;;  %v4368_v4 = vld [vmem:[#allocation8 + $0x548] ss:$16 sps:$4 sm:$0xff]   ;;  %v4382_v10 = vld [vmem:[#allocation8 + $0x58c] ss:$16 sps:$4 sm:$0xff]  }
 0x19b   :  { %v4371_v7 = vld [vmem:[#allocation8 + $0x560] ss:$16 sps:$4 sm:$0xff]  }
 0x19c   :  { %3310 = vmatmul.mubr.bf16.vlgmr.msra.gmra.mrb[16].mxu0 %v1672_v11  ;;  %3474 = vmatmul.mubr.bf16.vlgmr.msra.gmra.mrb[16].mxu1 %v1672_v11  ;;  %v4377_v11 = vld [vmem:[#allocation8 + $0x580] ss:$16 sps:$4 sm:$0xff]  }
 0x19d   :  { %3319 = vmatpush1.bf16.msra.mxu0 %v4305_v8  ;;  %3483 = vmatpush1.bf16.msra.mxu1 %v4308_v9  ;;  %v4374_v8 = vld [vmem:[#allocation8 + $0x568] ss:$16 sps:$4 sm:$0xff]   ;;  %v4379_v9 = vld [vmem:[#allocation8 + $0x584] ss:$16 sps:$4 sm:$0xff]  }
 0x19e   :  { %3320 = vmatprep.subr.bf16.mxu0 %v4313_v14  ;;  %3484 = vmatprep.subr.bf16.mxu1 %v4316_v15  ;;  %v4380_v14 = vld [vmem:[#allocation8 + $0x588] ss:$16 sps:$4 sm:$0xff]   ;;  %v1632_v15 = vsub.s32 4, %v4686_v29 }
 0x1a1   :  { %3321 = vmatpush1.bf16.msra.mxu0 %v4311_v16  ;;  %3485 = vmatpush1.bf16.msra.mxu1 %v4314_v17  ;;  %v4385_v16 = vld [vmem:[#allocation8 + $0x5a4] ss:$16 sps:$4 sm:$0xff]   ;;  %v4388_v17 = vld [vmem:[#allocation8 + $0x5ac] ss:$16 sps:$4 sm:$0xff]  }
 0x1a2   :  { %3322 = vmatprep.subr.bf16.mxu0 %v4319_v18  ;;  %3486 = vmatprep.subr.bf16.mxu1 %v4322_v19  ;;  %v4383_v18 = vld [vmem:[#allocation8 + $0x5a0] ss:$16 sps:$4 sm:$0xff]   ;;  %v4386_v19 = vld [vmem:[#allocation8 + $0x5a8] ss:$16 sps:$4 sm:$0xff]  }
 0x1a5   :  { %3323 = vmatpush1.bf16.msra.mxu0 %v4317_v21  ;;  %3487 = vmatpush1.bf16.msra.mxu1 %v4320_v22  ;;  %v1633_v21 = vrot.slane %v4694_v31, %v1632_v15  ;;  %v4391_v22 = vld [vmem:[#allocation8 + $0x5c4] ss:$16 sps:$4 sm:$0xff]   ;;  %v4437_v15 = vld [vmem:[#allocation8 + $0x6c0] ss:$16 sps:$4 sm:$0xff]  }
 0x1a6   :  { %3324 = vmatprep.subr.bf16.mxu0 %v4325_v23  ;;  %3488 = vmatprep.subr.bf16.mxu1 %v4328_v24  ;;  %v4394_v23 = vld [vmem:[#allocation8 + $0x5cc] ss:$16 sps:$4 sm:$0xff]   ;;  %v4389_v24 = vld [vmem:[#allocation8 + $0x5c0] ss:$16 sps:$4 sm:$0xff]  }
 0x1a9   :  { %3325 = vmatpush1.bf16.msra.mxu0 %v4323_v25  ;;  %3489 = vmatpush1.bf16.msra.mxu1 %v4326_v43  ;;  %v4392_v25 = vld [vmem:[#allocation8 + $0x5c8] ss:$16 sps:$4 sm:$0xff]  }
 0x1aa   :  { %3326 = vmatprep.subr.bf16.mxu0 %v4331_v26  ;;  %3490 = vmatprep.subr.bf16.mxu1 %v4334_v27  ;;  %v4397_v27 = vld [vmem:[#allocation8 + $0x5e4] ss:$16 sps:$4 sm:$0xff]  }
 0x1ad   :  { %3327 = vmatpush1.bf16.msra.mxu0 %v4329_v28  ;;  %3491 = vmatpush1.bf16.msra.mxu1 %v4332_v33  ;;  %v4400_v28 = vld [vmem:[#allocation8 + $0x5ec] ss:$16 sps:$4 sm:$0xff]  }
 0x1ae   :  { %3328 = vmatprep.subr.bf16.mxu0 %v4337_v34  ;;  %3492 = vmatprep.subr.bf16.mxu1 %v4340_v35  ;;  %v1644_v34 = vsub.s32 7, %v4686_v29 }
 0x1b0   :  { %v1431_v40 = vpop.f32.mrb[8].mxu0 }
 0x1b1   :  { %3329 = vmatpush1.bf16.msra.mxu0 %v4335_v36  ;;  %3493 = vmatpush1.bf16.msra.mxu1 %v4338_v37  ;;  %v4720_v45 = vadd.f32 %v1472_v5, %v1431_v40  ;;  %v1433_v46 = vpop.f32.mrb[9].mxu0  ;;  %v4373_v5 = vld [vmem:[#allocation8 + $0x564] ss:$16 sps:$4 sm:$0xff]   ;;  %v4395_v37 = vld [vmem:[#allocation8 + $0x5e0] ss:$16 sps:$4 sm:$0xff]  }
 0x1b2   :  { %3330 = vmatprep.subr.bf16.mxu0 %v4343_v13  ;;  %3494 = vmatprep.subr.bf16.mxu1 %v4346_v39  ;;  %v1475_v49 = vadd.f32 %v4716_v6, %v1433_v46  ;;  %v1435_v50 = vpop.f32.mrb[10].mxu0  ;;  %v4376_v6 = vld [vmem:[#allocation8 + $0x56c] ss:$16 sps:$4 sm:$0xff]   ;;  %v4403_v39 = vld [vmem:[#allocation8 + $0x604] ss:$16 sps:$4 sm:$0xff]  }
 0x1b3   :  { %v1436_v51 = vpop.f32.mrb[11].mxu0  ;;  %v1658_v26 = vadd.f32 %v1633_v21, %v4720_v45  ;;  %v4406_v40 = vld [vmem:[#allocation8 + $0x60c] ss:$16 sps:$4 sm:$0xff]   ;;  %v4446_v21 = vld [vmem:[#allocation8 + $0x6e8] ss:$16 sps:$4 sm:$0xff]  }
 0x1b4   :  { %v1659_v53 = vadd.f32 %v1637_v41, %v1475_v49  ;;  %v4404_v49 = vld [vmem:[#allocation8 + $0x608] ss:$16 sps:$4 sm:$0xff]  }
 0x1b5   :  { %3331 = vmatpush1.bf16.msra.mxu0 %v4341_v42  ;;  %3495 = vmatpush1.bf16.msra.mxu1 %v4344_v44  ;;  %v1666_v13 = vmax.f32 %v1658_v26, 0.0  ;;  %v1645_v42 = vrot.slane %v4694_v31, %v1644_v34  ;;  %v4460_v26 = vld [vmem:[#allocation8 + $0x72c] ss:$16 sps:$4 sm:$0xff]  }
 0x1b6   :  { %3332 = vmatprep.subr.bf16.mxu0 %v4349_v48  ;;  %3496 = vmatprep.subr.bf16.mxu1 %v4352_v1  ;;  %v1667_v57 = vmax.f32 %v1659_v53, 0.0  ;;  %v4401_v1 = vld [vmem:[#allocation8 + $0x600] ss:$16 sps:$4 sm:$0xff]   ;;  %v4409_v53 = vld [vmem:[#allocation8 + $0x624] ss:$16 sps:$4 sm:$0xff]  }
 0x1b7   :  { %v1674_v51 = vpack.c.bf16 %v1666_v13, %v1666_v13  ;;  %v4466_v34 = vld [vmem:[#allocation8 + $0x74c] ss:$16 sps:$4 sm:$0xff]   ;;  %v4467_v13 = vld [vmem:[#allocation8 + $0x760] ss:$16 sps:$4 sm:$0xff]  }
 0x1b8   :  { %v1675_v58 = vpack.c.bf16 %v1667_v57, %v1667_v57  ;;  %v4410_v57 = vld [vmem:[#allocation8 + $0x628] ss:$16 sps:$4 sm:$0xff]  }
 0x1b9   :  { %3333 = vmatpush1.bf16.msra.mxu0 %v4347_v54  ;;  %3497 = vmatpush1.bf16.msra.mxu1 %v4350_v55  ;;  %v4412_v54 = vld [vmem:[#allocation8 + $0x62c] ss:$16 sps:$4 sm:$0xff]  }
 0x1ba   :  { %3334 = vmatprep.subr.bf16.mxu0 %v4355_v20  ;;  %3498 = vmatprep.subr.bf16.mxu1 %v4358_v56  ;;  %v4407_v56 = vld [vmem:[#allocation8 + $0x620] ss:$16 sps:$4 sm:$0xff]  }
 0x1bb   :  { %3350 = vmatprep.mubr.bf16.mxu0 %v1675_v58  ;;  %3514 = vmatprep.mubr.bf16.mxu1 %v1675_v58  ;;  %v4415_v58 = vld [vmem:[#allocation8 + $0x644] ss:$16 sps:$4 sm:$0xff]  }
 0x1bd   :  { %3335 = vmatpush1.bf16.msra.mxu0 %v4353_v59  ;;  %3499 = vmatpush1.bf16.msra.mxu1 %v4356_v60  ;;  %v4418_v59 = vld [vmem:[#allocation8 + $0x64c] ss:$16 sps:$4 sm:$0xff]  }
 0x1be   :  { %3336 = vmatprep.subr.bf16.mxu0 %v4361_v47  ;;  %3500 = vmatprep.subr.bf16.mxu1 %v4364_v61  ;;  %v4413_v47 = vld [vmem:[#allocation8 + $0x640] ss:$16 sps:$4 sm:$0xff]   ;;  %v4416_v61 = vld [vmem:[#allocation8 + $0x648] ss:$16 sps:$4 sm:$0xff]  }
 0x1c1   :  { %3337 = vmatpush1.bf16.msra.mxu0 %v4359_v62  ;;  %3501 = vmatpush1.bf16.msra.mxu1 %v4362_v63  ;;  %v4421_v62 = vld [vmem:[#allocation8 + $0x664] ss:$16 sps:$4 sm:$0xff]   ;;  %v4424_v63 = vld [vmem:[#allocation8 + $0x66c] ss:$16 sps:$4 sm:$0xff]  }
 0x1c2   :  { %3338 = vmatprep.subr.bf16.mxu0 %v4367_v0  ;;  %3502 = vmatprep.subr.bf16.mxu1 %v4370_v2  ;;  %v4419_v0 = vld [vmem:[#allocation8 + $0x660] ss:$16 sps:$4 sm:$0xff]   ;;  %v4422_v2 = vld [vmem:[#allocation8 + $0x668] ss:$16 sps:$4 sm:$0xff]  }
 0x1c5   :  { %3339 = vmatpush1.bf16.msra.mxu0 %v4365_v3  ;;  %3503 = vmatpush1.bf16.msra.mxu1 %v4368_v4  ;;  %v4427_v3 = vld [vmem:[#allocation8 + $0x684] ss:$16 sps:$4 sm:$0xff]   ;;  %v4430_v4 = vld [vmem:[#allocation8 + $0x68c] ss:$16 sps:$4 sm:$0xff]  }
 0x1c6   :  { %3340 = vmatprep.subr.bf16.mxu0 %v4373_v5  ;;  %3504 = vmatprep.subr.bf16.mxu1 %v4376_v6  ;;  %v4425_v5 = vld [vmem:[#allocation8 + $0x680] ss:$16 sps:$4 sm:$0xff]   ;;  %v4428_v6 = vld [vmem:[#allocation8 + $0x688] ss:$16 sps:$4 sm:$0xff]  }
 0x1c9   :  { %3341 = vmatpush1.bf16.msra.mxu0 %v4371_v7  ;;  %3505 = vmatpush1.bf16.msra.mxu1 %v4374_v8  ;;  %v4433_v7 = vld [vmem:[#allocation8 + $0x6a4] ss:$16 sps:$4 sm:$0xff]   ;;  %v4436_v8 = vld [vmem:[#allocation8 + $0x6ac] ss:$16 sps:$4 sm:$0xff]  }
 0x1ca   :  { %3342 = vmatprep.subr.bf16.mxu0 %v4379_v9  ;;  %3506 = vmatprep.subr.bf16.mxu1 %v4382_v10  ;;  %v4431_v9 = vld [vmem:[#allocation8 + $0x6a0] ss:$16 sps:$4 sm:$0xff]   ;;  %v4434_v10 = vld [vmem:[#allocation8 + $0x6a8] ss:$16 sps:$4 sm:$0xff]  }
 0x1cd   :  { %3343 = vmatpush1.bf16.msra.mxu0 %v4377_v11  ;;  %3507 = vmatpush1.bf16.msra.mxu1 %v4380_v14  ;;  %v4439_v11 = vld [vmem:[#allocation8 + $0x6c4] ss:$16 sps:$4 sm:$0xff]   ;;  %v4442_v14 = vld [vmem:[#allocation8 + $0x6cc] ss:$16 sps:$4 sm:$0xff]  }
 0x1ce   :  { %3344 = vmatprep.subr.bf16.mxu0 %v4385_v16  ;;  %3508 = vmatprep.subr.bf16.mxu1 %v4388_v17  ;;  %v4440_v16 = vld [vmem:[#allocation8 + $0x6c8] ss:$16 sps:$4 sm:$0xff]   ;;  %v4445_v17 = vld [vmem:[#allocation8 + $0x6e4] ss:$16 sps:$4 sm:$0xff]  }
 0x1d0   :  { %v1554_v43 = vpop.f32.mrb[12].mxu0 }
 0x1d1   :  { %3345 = vmatpush1.bf16.msra.mxu0 %v4383_v18  ;;  %3509 = vmatpush1.bf16.msra.mxu1 %v4386_v19  ;;  %v1556_v33 = vpop.f32.mrb[13].mxu0  ;;  %v4448_v18 = vld [vmem:[#allocation8 + $0x6ec] ss:$16 sps:$4 sm:$0xff]   ;;  %v4443_v19 = vld [vmem:[#allocation8 + $0x6e0] ss:$16 sps:$4 sm:$0xff]  }
 0x1d2   :  { %3346 = vmatprep.subr.bf16.mxu0 %v4391_v22  ;;  %3510 = vmatprep.subr.bf16.mxu1 %v4394_v23  ;;  %v1558_v35 = vpop.f32.mrb[14].mxu0  ;;  %v4451_v22 = vld [vmem:[#allocation8 + $0x704] ss:$16 sps:$4 sm:$0xff]   ;;  %v4454_v23 = vld [vmem:[#allocation8 + $0x70c] ss:$16 sps:$4 sm:$0xff]  }
 0x1d3   :  { %v1559_v36 = vpop.f32.mrb[15].mxu0  ;;  %v4461_v35 = vld [vmem:[#allocation8 + $0x740] ss:$16 sps:$4 sm:$0xff]  }
 0x1d4   :  { %v4464_v36 = vld [vmem:[#allocation8 + $0x748] ss:$16 sps:$4 sm:$0xff]  }
 0x1d5   :  { %3347 = vmatpush1.bf16.msra.mxu0 %v4389_v24  ;;  %3511 = vmatpush1.bf16.msra.mxu1 %v4392_v25  ;;  %v4449_v24 = vld [vmem:[#allocation8 + $0x700] ss:$16 sps:$4 sm:$0xff]   ;;  %v4452_v25 = vld [vmem:[#allocation8 + $0x708] ss:$16 sps:$4 sm:$0xff]  }
 0x1d6   :  { %3348 = vmatprep.subr.bf16.mxu0 %v4397_v27  ;;  %3512 = vmatprep.subr.bf16.mxu1 %v4400_v28  ;;  %v1513_v41 = vpop.f32.mrb[12].mxu1  ;;  %v4455_v27 = vld [vmem:[#allocation8 + $0x720] ss:$16 sps:$4 sm:$0xff]   ;;  %v4458_v28 = vld [vmem:[#allocation8 + $0x728] ss:$16 sps:$4 sm:$0xff]  }
 0x1d7   :  { %v4728_v44 = vadd.f32 %v1554_v43, %v1513_v41  ;;  %v1515_v45 = vpop.f32.mrb[13].mxu1  ;;  %v4457_v43 = vld [vmem:[#allocation8 + $0x724] ss:$16 sps:$4 sm:$0xff]   ;;  %v4478_v41 = vld [vmem:[#allocation8 + $0x78c] ss:$16 sps:$4 sm:$0xff]  }
 0x1d8   :  { %v1557_v46 = vadd.f32 %v1556_v33, %v1515_v45  ;;  %v1517_v48 = vpop.f32.mrb[14].mxu1  ;;  %v4463_v33 = vld [vmem:[#allocation8 + $0x744] ss:$16 sps:$4 sm:$0xff]   ;;  %v4476_v45 = vld [vmem:[#allocation8 + $0x788] ss:$16 sps:$4 sm:$0xff]  }
 0x1d9   :  { %3349 = vmatpush1.bf16.msra.mxu0 %v4395_v37  ;;  %3513 = vmatpush1.bf16.msra.mxu1 %v4398_v38  ;;  %v1518_v50 = vpop.f32.mrb[15].mxu1  ;;  %v4469_v37 = vld [vmem:[#allocation8 + $0x764] ss:$16 sps:$4 sm:$0xff]   ;;  %v4472_v38 = vld [vmem:[#allocation8 + $0x76c] ss:$16 sps:$4 sm:$0xff]  }
 0x1da   :  { %3359 = vmatprep.subr.bf16.mxu0 %v4403_v39  ;;  %3523 = vmatprep.subr.bf16.mxu1 %v4406_v40  ;;  %v1661_v55 = vadd.f32 %v1645_v42, %v1557_v46  ;;  %v4470_v39 = vld [vmem:[#allocation8 + $0x768] ss:$16 sps:$4 sm:$0xff]   ;;  %v4475_v40 = vld [vmem:[#allocation8 + $0x784] ss:$16 sps:$4 sm:$0xff]   ;;  %v4473_v42 = vld [vmem:[#allocation8 + $0x780] ss:$16 sps:$4 sm:$0xff]  }
 0x1db   :  { %v1640_v46 = vsub.s32 6, %v4686_v29  ;;  %v4481_v48 = vld [vmem:[#allocation8 + $0x7a4] ss:$16 sps:$4 sm:$0xff]   ;;  %v4482_v50 = vld [vmem:[#allocation8 + $0x7a8] ss:$16 sps:$4 sm:$0xff]  }
 0x1dc   :  { %3351 = vmatmul.mubr.bf16.vlgmr.msra.gmra.mrb[16].mxu0 %v1674_v51  ;;  %3515 = vmatmul.mubr.bf16.vlgmr.msra.gmra.mrb[16].mxu1 %v1674_v51  ;;  %v1669_v20 = vmax.f32 %v1661_v55, 0.0  ;;  %v4485_v55 = vld [vmem:[#allocation8 + $0x7c0] ss:$16 sps:$4 sm:$0xff]  }
 0x1dd   :  { %3360 = vmatpush1.bf16.msra.mxu0 %v4401_v1  ;;  %3524 = vmatpush1.bf16.msra.mxu1 %v4404_v49  ;;  %v4484_v1 = vld [vmem:[#allocation8 + $0x7ac] ss:$16 sps:$4 sm:$0xff]   ;;  %v4479_v49 = vld [vmem:[#allocation8 + $0x7a0] ss:$16 sps:$4 sm:$0xff]   ;;  %v1641_v51 = vrot.slane %v4694_v31, %v1640_v46 }
 0x1de   :  { %3361 = vmatprep.subr.bf16.mxu0 %v4409_v53  ;;  %3525 = vmatprep.subr.bf16.mxu1 %v4412_v54  ;;  %v1677_v60 = vpack.c.bf16 %v1669_v20, %v1669_v20  ;;  %v4487_v53 = vld [vmem:[#allocation8 + $0x7c4] ss:$16 sps:$4 sm:$0xff]   ;;  %v4490_v54 = vld [vmem:[#allocation8 + $0x7cc] ss:$16 sps:$4 sm:$0xff]   ;;  %v4488_v20 = vld [vmem:[#allocation8 + $0x7c8] ss:$16 sps:$4 sm:$0xff]  }
 0x1df   :  { %v1660_v29 = vadd.f32 %v1641_v51, %v4728_v44  ;;  %v1934_v44 = vld [vmem:[%s4754_s4] sm:$0xf] }
 0x1e0   :  { %3391 = vmatprep.mubr.bf16.mxu0 %v1677_v60  ;;  %3555 = vmatprep.mubr.bf16.mxu1 %v1677_v60 }
 0x1e1   :  { %3362 = vmatpush1.bf16.msra.mxu0 %v4407_v56  ;;  %3526 = vmatpush1.bf16.msra.mxu1 %v4410_v57  ;;  %v4493_v56 = vld [vmem:[#allocation8 + $0x7e4] ss:$16 sps:$4 sm:$0xff]   ;;  %v4496_v57 = vld [vmem:[#allocation8 + $0x7ec] ss:$16 sps:$4 sm:$0xff]   ;;  %v1668_v60 = vmax.f32 %v1660_v29, 0.0 }
 0x1e2   :  { %3363 = vmatprep.subr.bf16.mxu0 %v4415_v58  ;;  %3527 = vmatprep.subr.bf16.mxu1 %v4418_v59  ;;  %v4491_v58 = vld [vmem:[#allocation8 + $0x7e0] ss:$16 sps:$4 sm:$0xff]   ;;  %v4494_v59 = vld [vmem:[#allocation8 + $0x7e8] ss:$16 sps:$4 sm:$0xff]  }
 0x1e3   :  { %v1676_v31 = vpack.c.bf16 %v1668_v60, %v1668_v60 }
 0x1e5   :  { %3364 = vmatpush1.bf16.msra.mxu0 %v4413_v47  ;;  %3528 = vmatpush1.bf16.msra.mxu1 %v4416_v61  ;;  %v1939_v47 = vrot.slane %v1934_v44, %v4689_v30  ;;  %v1947_v61 = vrot.slane %v1934_v44, %v4711_v52 }
 0x1e6   :  { %3365 = vmatprep.subr.bf16.mxu0 %v4421_v62  ;;  %3529 = vmatprep.subr.bf16.mxu1 %v4424_v63  ;;  %v3568_v62 = vld [vmem:[%s4755_s5] sm:$0xf]  ;;  %v1943_v63 = vrot.slane %v1934_v44, %v4697_v32 }
 0x1e9   :  { %3366 = vmatpush1.bf16.msra.mxu0 %v4419_v0  ;;  %3530 = vmatpush1.bf16.msra.mxu1 %v4422_v2  ;;  %v1951_v0 = vrot.slane %v1934_v44, %v4704_v12 }
 0x1ea   :  { %3367 = vmatprep.subr.bf16.mxu0 %v4427_v3  ;;  %3531 = vmatprep.subr.bf16.mxu1 %v4430_v4 }
 0x1ed   :  { %3368 = vmatpush1.bf16.msra.mxu0 %v4425_v5  ;;  %3532 = vmatpush1.bf16.msra.mxu1 %v4428_v6  ;;  %v3573_v5 = vrot.slane %v3568_v62, %v4689_v30  ;;  %v3585_v30 = vrot.slane %v3568_v62, %v4704_v12 }
 0x1ee   :  { %3369 = vmatprep.subr.bf16.mxu0 %v4433_v7  ;;  %3533 = vmatprep.subr.bf16.mxu1 %v4436_v8 }
 0x1f1   :  { %3370 = vmatpush1.bf16.msra.mxu0 %v4431_v9  ;;  %3534 = vmatpush1.bf16.msra.mxu1 %v4434_v10  ;;  %v3577_v10 = vrot.slane %v3568_v62, %v4697_v32 }
 0x1f2   :  { %3371 = vmatprep.subr.bf16.mxu0 %v4439_v11  ;;  %3535 = vmatprep.subr.bf16.mxu1 %v4442_v14 }
 0x1f5   :  { %3372 = vmatpush1.bf16.msra.mxu0 %v4437_v15  ;;  %3536 = vmatpush1.bf16.msra.mxu1 %v4440_v16 }
 0x1f6   :  { %3373 = vmatprep.subr.bf16.mxu0 %v4445_v17  ;;  %3537 = vmatprep.subr.bf16.mxu1 %v4448_v18 }
 0x1f9   :  { %3374 = vmatpush1.bf16.msra.mxu0 %v4443_v19  ;;  %3538 = vmatpush1.bf16.msra.mxu1 %v4446_v21  ;;  %v3581_v21 = vrot.slane %v3568_v62, %v4711_v52 }
 0x1fa   :  { %3375 = vmatprep.subr.bf16.mxu0 %v4451_v22  ;;  %3539 = vmatprep.subr.bf16.mxu1 %v4454_v23 }
 0x1fd   :  { %3376 = vmatpush1.bf16.msra.mxu0 %v4449_v24  ;;  %3540 = vmatpush1.bf16.msra.mxu1 %v4452_v25 }
 0x1fe   :  { %3377 = vmatprep.subr.bf16.mxu0 %v4457_v43  ;;  %3541 = vmatprep.subr.bf16.mxu1 %v4460_v26 }
 0x201   :  { %3378 = vmatpush1.bf16.msra.mxu0 %v4455_v27  ;;  %3542 = vmatpush1.bf16.msra.mxu1 %v4458_v28 }
 0x202   :  { %3379 = vmatprep.subr.bf16.mxu0 %v4463_v33  ;;  %3543 = vmatprep.subr.bf16.mxu1 %v4466_v34  ;;  %v4072_v33 = vld [vmem:[#allocation3] ss:$0 sm:$0xff] }
 0x205   :  { %3380 = vmatpush1.bf16.msra.mxu0 %v4461_v35  ;;  %3544 = vmatpush1.bf16.msra.mxu1 %v4464_v36 }
 0x206   :  { %3381 = vmatprep.subr.bf16.mxu0 %v4469_v37  ;;  %3545 = vmatprep.subr.bf16.mxu1 %v4472_v38 }
 0x209   :  { %3382 = vmatpush1.bf16.msra.mxu0 %v4467_v13  ;;  %3546 = vmatpush1.bf16.msra.mxu1 %v4470_v39 }
 0x20a   :  { %3383 = vmatprep.subr.bf16.mxu0 %v4475_v40  ;;  %3547 = vmatprep.subr.bf16.mxu1 %v4478_v41 }
 0x20d   :  { %3384 = vmatpush1.bf16.msra.mxu0 %v4473_v42  ;;  %3548 = vmatpush1.bf16.msra.mxu1 %v4476_v45 }
 0x20e   :  { %3385 = vmatprep.subr.bf16.mxu0 %v4481_v48  ;;  %3549 = vmatprep.subr.bf16.mxu1 %v4484_v1 }
 0x211   :  { %3386 = vmatpush1.bf16.msra.mxu0 %v4479_v49  ;;  %3550 = vmatpush1.bf16.msra.mxu1 %v4482_v50 }
 0x212   :  { %3387 = vmatprep.subr.bf16.mxu0 %v4487_v53  ;;  %3551 = vmatprep.subr.bf16.mxu1 %v4490_v54 }
 0x215   :  { %3388 = vmatpush1.bf16.msra.mxu0 %v4485_v55  ;;  %3552 = vmatpush1.bf16.msra.mxu1 %v4488_v20 }
 0x216   :  { %3389 = vmatprep.subr.bf16.mxu0 %v4493_v56  ;;  %3553 = vmatprep.subr.bf16.mxu1 %v4496_v57 }
 0x219   :  { %3390 = vmatpush1.bf16.msra.mxu0 %v4491_v58  ;;  %3554 = vmatpush1.bf16.msra.mxu1 %v4494_v59 }
 0x21c   :  { %3392 = vmatmul.mubr.bf16.vlgmr.msra.gmra.mrb[16].mxu0 %v1676_v31  ;;  %3556 = vmatmul.mubr.bf16.vlgmr.msra.gmra.mrb[16].mxu1 %v1676_v31 }
 0x2ef   :  { %v3393_v2 = vpop.f32.mrb[16].mxu0  ;;  %v3557_v3 = vpop.f32.mrb[16].mxu1 }
 0x2f0   :  { %v4074_v4 = vadd.f32 %v3393_v2, %v1939_v47  ;;  %v4076_v6 = vadd.f32 %v3557_v3, %v1947_v61  ;;  %v3395_v7 = vpop.f32.mrb[17].mxu0  ;;  %v3559_v8 = vpop.f32.mrb[17].mxu1 }
 0x2f1   :  { %v4075_v9 = vadd.f32 %v3395_v7, %v1943_v63  ;;  %v4077_v11 = vadd.f32 %v3559_v8, %v1951_v0  ;;  %v3397_v14 = vpop.f32.mrb[18].mxu0  ;;  %v3561_v15 = vpop.f32.mrb[18].mxu1 }
 0x2f2   :  { %v3564_v16 = vmax.f32 %v4074_v4, 0.0  ;;  %v3398_v17 = vpop.f32.mrb[19].mxu0  ;;  %v3562_v18 = vpop.f32.mrb[19].mxu1  ;;  %v3566_v19 = vmax.f32 %v4076_v6, 0.0 }
 0x2f3   :  { %v3565_v22 = vmax.f32 %v4075_v9, 0.0  ;;  %v3567_v25 = vmax.f32 %v4077_v11, 0.0 }
 0x2f4   :  { %v3590_v23 = vmul.f32 %v3573_v5, %v3564_v16  ;;  %v3592_v43 = vmul.f32 %v3581_v21, %v3566_v19 }
 0x2f5   :  { %v3591_v24 = vmul.f32 %v3577_v10, %v3565_v22  ;;  %v3593_v27 = vmul.f32 %v3585_v30, %v3567_v25 }
 0x2f7   :  { %v3594_v26 = vadd.f32 %v3591_v24, %v3590_v23 }
 0x2f9   :  { %v3595_v28 = vadd.f32 %v3594_v26, %v3592_v43 }
 0x2fb   :  { %v3596_v32 = vadd.f32 %v3595_v28, %v3593_v27 }
 0x2fd   :  { %3597 = vadd.xlane.f32.xlu0 %v3596_v32 }
 0x38a   :  { %v3598_v34 = vpop.xlane.xlu0 %3597 }
 0x38b   :  { %v3606_v35 = vadd.f32 %v4072_v33, %v3598_v34 }
 0x38d   :  { %v4073_v36 = vmul.f32 -1.442695, %v3606_v35 }
 0x38f   :  { %4497 = vpow2.f32 %v4073_v36 }
 0x399   :  { %v4498_v37 = vpop.eup %4497 }
 0x39a   :  { %v3610_v38 = vadd.f32 1.0, %v4498_v37 }
 0x39c   :  { %4499 = vrcp.f32 %v3610_v38 }
 0x3a6   :  { %v4500_v52 = vpop.eup %4499 }
 0x3a7   :  { %3614 = vst.msk [vmem:[%s4757_s7] sm:$0xff] %vm3613_vm0, %v4500_v52 }
 0x3a8   :  { %3619 = vsyncpa [#allocation5], 1 }
 0x3a9   :  { %3620 = vsyncpa [#allocation7], 1 }

</bundles_post_ra>
